<compile_context>
chip_gen: v7x
topology: tpu7x:2x2x1
jax: 0.10.0
libtpu: 0.0.40
codegen_flags: <defaults>
</compile_context>

<pallas_src>
import jax
import jax.numpy as jnp
from jax.experimental import pallas as pl
from jax.experimental.pallas import tpu as pltpu


def _round_up(n, m):
    return -(-n // m) * m


def _packed_kernel(eps):
    """C divides 128: G = 128//C rows packed per 128-lane super-row."""

    def kernel(x_ref, a_ref, w_ref, b_ref, o_ref):
        xf = x_ref[...].astype(jnp.float32)
        a = a_ref[...]                                   # (128,128) block-diag 1/C
        mu = jnp.dot(xf, a, preferred_element_type=jnp.float32,
                     precision=jax.lax.Precision.HIGHEST)
        centered = xf - mu
        var = jnp.dot(centered * centered, a,
                      preferred_element_type=jnp.float32,
                      precision=jax.lax.Precision.HIGHEST)
        inv = jax.lax.rsqrt(var + eps)                   # EUP slot, hidden
        o_ref[...] = (centered * (inv * w_ref[...]) + b_ref[...]).astype(o_ref.dtype)

    return kernel


def _unpacked_kernel(eps, C):
    """Fallback for C that does not divide 128 (or C > 128): XLU row reduce."""
    inv_c = 1.0 / C

    def kernel(x_ref, w_ref, b_ref, o_ref):
        xf = x_ref[...].astype(jnp.float32)
        mu = jnp.sum(xf, axis=-1, keepdims=True) * inv_c
        centered = xf - mu
        var = jnp.sum(centered * centered, axis=-1, keepdims=True) * inv_c
        inv = jax.lax.rsqrt(var + eps)
        o_ref[...] = (centered * (inv * w_ref[...]) + b_ref[...]).astype(o_ref.dtype)

    return kernel


def withbias_layernorm(x, weight, bias, *, eps=1e-5, target_block_bytes=2 << 20):
    """x: (..., C); weight, bias: (C,). Returns the same shape/dtype as x."""
    orig_shape = x.shape
    out_dtype = x.dtype
    C = orig_shape[-1]
    assert weight.shape == (C,) and bias.shape == (C,)

    x2 = x.reshape(-1, C)
    R = x2.shape[0]
    itemsize = jnp.dtype(out_dtype).itemsize
    sub = max(8, 32 // itemsize)            # sublane granularity of the row tile

    packed = (C <= 128) and (128 % C == 0)
    G = (128 // C) if packed else 1         # rows per 128-lane super-row
    GC = G * C

    # Pad rows only to a multiple of G*sub (tiny; a no-op for typical shapes).
    # Padded rows are zero -> finite outputs, dropped after the kernel.
    R_pad = _round_up(R, G * sub)
    if R_pad != R:
        x2 = jnp.pad(x2, ((0, R_pad - R), (0, 0)))
    Rp = R_pad // G
    xp = x2.reshape(Rp, GC)                 # contiguous reshape: free

    # Row-tile size, derived from the f32 working set so bf16 inputs don't
    # blow up VMEM with f32 temporaries.  No minimum-step-count heuristic.
    work_row_bytes = GC * 4
    hbm_row_bytes = GC * itemsize
    tr = (target_block_bytes // work_row_bytes) // sub * sub
    tr = max(sub, min(tr, Rp))
    # Give v7x's second TensorCore work when both halves stay >= 512 KiB.
    half = _round_up(-(-Rp // 2), sub)
    if half * hbm_row_bytes >= (512 << 10):
        tr = min(tr, half)

    grid = (pl.cdiv(Rp, tr),)               # ragged last block handled by Pallas

    w32 = weight.astype(jnp.float32).reshape(1, C)
    b32 = bias.astype(jnp.float32).reshape(1, C)

    if packed:
        lane = jnp.arange(GC, dtype=jnp.int32)
        a_mean = jnp.where((lane[:, None] // C) == (lane[None, :] // C),
                           jnp.float32(1.0 / C), jnp.float32(0.0))
        args = (xp, a_mean, jnp.tile(w32, (1, G)), jnp.tile(b32, (1, G)))
        in_specs = [
            pl.BlockSpec((tr, GC), lambda i: (i, 0)),
            pl.BlockSpec((GC, GC), lambda i: (0, 0)),   # resident across steps
            pl.BlockSpec((1, GC), lambda i: (0, 0)),
            pl.BlockSpec((1, GC), lambda i: (0, 0)),
        ]
        kernel = _packed_kernel(eps)
    else:
        args = (xp, w32, b32)
        in_specs = [
            pl.BlockSpec((tr, GC), lambda i: (i, 0)),
            pl.BlockSpec((1, GC), lambda i: (0, 0)),
            pl.BlockSpec((1, GC), lambda i: (0, 0)),
        ]
        kernel = _unpacked_kernel(eps, C)

    out = pl.pallas_call(
        kernel,
        out_shape=jax.ShapeDtypeStruct((Rp, GC), out_dtype),
        grid_spec=pltpu.PrefetchScalarGridSpec(
            num_scalar_prefetch=0,
            grid=grid,
            in_specs=in_specs,
            out_specs=pl.BlockSpec((tr, GC), lambda i: (i, 0)),
        ),
        compiler_params=pltpu.CompilerParams(
            dimension_semantics=("parallel",),
            vmem_limit_bytes=40 << 20,
        ),
    )(*args)

    out = out.reshape(R_pad, C)
    if R_pad != R:
        out = out[:R]                        # only when the tiny pad triggered
    return out.reshape(orig_shape)


def _reference_layernorm(x, weight, bias, eps=1e-5):
    x32 = x.astype(jnp.float32)
    mu = jnp.mean(x32, axis=-1, keepdims=True)
    var = jnp.mean((x32 - mu) ** 2, axis=-1, keepdims=True)
    y = (x32 - mu) / jnp.sqrt(var + eps) * weight.astype(jnp.float32) \
        + bias.astype(jnp.float32)
    return y.astype(x.dtype)


if __name__ == "__main__":
    key = jax.random.PRNGKey(0)
    kx, kw, kb, k2, k3 = jax.random.split(key, 5)

    # tokens x channels, as produced by to_3d(x) in the parent model
    B, H, W, C = 2, 16, 16, 32
    x = jax.random.normal(kx, (B, H * W, C), dtype=jnp.float32)
    weight = jnp.ones((C,), dtype=jnp.float32)   # nn.Parameter(torch.ones)
    bias = jnp.zeros((C,), dtype=jnp.float32)    # nn.Parameter(torch.zeros)

    y = jax.block_until_ready(withbias_layernorm(x, weight, bias))
    assert y.shape == x.shape and y.dtype == x.dtype
    assert jnp.allclose(y, _reference_layernorm(x, weight, bias),
                        atol=2e-5, rtol=2e-5)

    # non-trivial affine params + a row count needing the (tiny) G*sublane pad
    w_rnd = jax.random.normal(kw, (C,), dtype=jnp.float32)
    b_rnd = jax.random.normal(kb, (C,), dtype=jnp.float32)
    x_odd = jax.random.normal(k2, (3, 50, C), dtype=jnp.float32)
    y_odd = jax.block_until_ready(withbias_layernorm(x_odd, w_rnd, b_rnd))
    assert jnp.allclose(y_odd, _reference_layernorm(x_odd, w_rnd, b_rnd),
                        atol=2e-5, rtol=2e-5)

    # multi-block grid with a ragged last block (forced small tile)
    x_rag = jax.random.normal(k3, (5, 77, C), dtype=jnp.float32)
    y_rag = jax.block_until_ready(
        withbias_layernorm(x_rag, w_rnd, b_rnd, target_block_bytes=16 << 10))
    assert jnp.allclose(y_rag, _reference_layernorm(x_rag, w_rnd, b_rnd),
                        atol=2e-5, rtol=2e-5)

    print("KERNEL_OK")
</pallas_src>

<mosaic_0001>
module attributes {stable_mosaic.version = 11 : i64} {
  func.func @kernel(%arg0: i32, %arg1: memref<128x128xf32, #tpu.memory_space<vmem>>, %arg2: memref<128x128xf32, #tpu.memory_space<vmem>>, %arg3: memref<1x128xf32, #tpu.memory_space<vmem>>, %arg4: memref<1x128xf32, #tpu.memory_space<vmem>>, %arg5: memref<128x128xf32, #tpu.memory_space<vmem>>) attributes {dimension_semantics = [#tpu.dimension_semantics<parallel>], iteration_bounds = array<i64: 1>, scalar_prefetch = 0 : i64, scratch_operands = 0 : i64, tpu.core_type = #tpu.core_type<tc>, window_params = [{transform_indices = @transform_0, window_bounds = array<i64: 128, 128>}, {pipeline_mode = #tpu.pipeline_mode<synchronous>, transform_indices = @transform_1, window_bounds = array<i64: 128, 128>}, {pipeline_mode = #tpu.pipeline_mode<synchronous>, transform_indices = @transform_2, window_bounds = array<i64: 1, 128>}, {pipeline_mode = #tpu.pipeline_mode<synchronous>, transform_indices = @transform_3, window_bounds = array<i64: 1, 128>}, {transform_indices = @transform_4, window_bounds = array<i64: 128, 128>}]} {
    %c0 = arith.constant 0 : index
    %c0_0 = arith.constant 0 : index
    %0 = vector.load %arg1[%c0, %c0_0] : memref<128x128xf32, #tpu.memory_space<vmem>>, vector<128x128xf32>
    %c0_1 = arith.constant 0 : index
    %c0_2 = arith.constant 0 : index
    %1 = vector.load %arg2[%c0_1, %c0_2] : memref<128x128xf32, #tpu.memory_space<vmem>>, vector<128x128xf32>
    %cst = arith.constant dense<0.000000e+00> : vector<128x128xf32>
    %2 = tpu.matmul %0, %1, %cst {dimension_numbers = #tpu.dot_dimension_numbers<[1], [0], [0], [1], [0, 0, 1, 1], [], []>, precision = #tpu.contract_precision<fp32>} : vector<128x128xf32>, vector<128x128xf32>, vector<128x128xf32> -> vector<128x128xf32>
    %3 = arith.subf %0, %2 : vector<128x128xf32>
    %4 = arith.mulf %3, %3 : vector<128x128xf32>
    %cst_3 = arith.constant dense<0.000000e+00> : vector<128x128xf32>
    %5 = tpu.matmul %4, %1, %cst_3 {dimension_numbers = #tpu.dot_dimension_numbers<[1], [0], [0], [1], [0, 0, 1, 1], [], []>, precision = #tpu.contract_precision<fp32>} : vector<128x128xf32>, vector<128x128xf32>, vector<128x128xf32> -> vector<128x128xf32>
    %cst_4 = arith.constant 9.99999974E-6 : f32
    %6 = vector.broadcast %cst_4 : f32 to vector<128x128xf32>
    %7 = arith.addf %5, %6 : vector<128x128xf32>
    %8 = math.rsqrt %7 : vector<128x128xf32>
    %c0_5 = arith.constant 0 : index
    %c0_6 = arith.constant 0 : index
    %9 = vector.load %arg3[%c0_5, %c0_6] : memref<1x128xf32, #tpu.memory_space<vmem>>, vector<1x128xf32>
    %10 = vector.broadcast %9 : vector<1x128xf32> to vector<128x128xf32>
    %11 = arith.mulf %8, %10 : vector<128x128xf32>
    %12 = arith.mulf %3, %11 : vector<128x128xf32>
    %c0_7 = arith.constant 0 : index
    %c0_8 = arith.constant 0 : index
    %13 = vector.load %arg4[%c0_7, %c0_8] : memref<1x128xf32, #tpu.memory_space<vmem>>, vector<1x128xf32>
    %14 = vector.broadcast %13 : vector<1x128xf32> to vector<128x128xf32>
    %15 = arith.addf %12, %14 : vector<128x128xf32>
    %c0_9 = arith.constant 0 : index
    %c0_10 = arith.constant 0 : index
    %16 = vector.load %arg5[%c0_9, %c0_10] : memref<128x128xf32, #tpu.memory_space<vmem>>, vector<128x128xf32>
    tpu.vector_store %arg5[%c0_9, %c0_10], %15 {strides = array<i32>} : memref<128x128xf32, #tpu.memory_space<vmem>>, vector<128x128xf32>,
    return
  }
  func.func @transform_0(%arg0: i32) -> (i32, i32) {
    %c0_i32 = arith.constant 0 : i32
    %c0_i32_0 = arith.constant 0 : i32
    return %arg0, %c0_i32 : i32, i32
  }
  func.func @transform_1(%arg0: i32) -> (i32, i32) {
    %c0_i32 = arith.constant 0 : i32
    %c0_i32_0 = arith.constant 0 : i32
    %c0_i32_1 = arith.constant 0 : i32
    return %c0_i32, %c0_i32_0 : i32, i32
  }
  func.func @transform_2(%arg0: i32) -> (i32, i32) {
    %c0_i32 = arith.constant 0 : i32
    %c0_i32_0 = arith.constant 0 : i32
    %c0_i32_1 = arith.constant 0 : i32
    return %c0_i32, %c0_i32_0 : i32, i32
  }
  func.func @transform_3(%arg0: i32) -> (i32, i32) {
    %c0_i32 = arith.constant 0 : i32
    %c0_i32_0 = arith.constant 0 : i32
    %c0_i32_1 = arith.constant 0 : i32
    return %c0_i32, %c0_i32_0 : i32, i32
  }
  func.func @transform_4(%arg0: i32) -> (i32, i32) {
    %c0_i32 = arith.constant 0 : i32
    %c0_i32_0 = arith.constant 0 : i32
    return %arg0, %c0_i32 : i32, i32
  }
}

</mosaic_0001>

<bundles_post_ra>
// kernel: tpu_custom_call.1
= control target key start
LH: loop header
LB: loop body
LE: loop exit
PB: predicated region body
PF: predicated region fallthrough
CT: control target
= control target key end

     0   :  { %9 = vsyncpa [#allocation3], 0  ;;  %s5779_s0 = inlined_call_operand.hbm [shape: f32[128,128], index: 0, kind: input, shape index: {}]   ;;  %s5780_s1 = inlined_call_operand.hbm [shape: f32[128,128], index: 1, kind: input, shape index: {}]   ;;  %s5781_s2 = inlined_call_operand.vmem [shape: f32[1,128], index: 2, kind: input, shape index: {}]   ;;  %s5782_s3 = inlined_call_operand.vmem [shape: f32[1,128], index: 3, kind: input, shape index: {}]   ;;  %s5783_s4 = inlined_call_operand.hbm [shape: f32[128,128], index: 4, kind: output, shape index: {}]  }
   0x1   :  { %10 = vsyncpa [#allocation6], 0 }
   0x2   :  { %11 = vsyncpa [#allocation4], 0  ;;  %s4521_s15 = smov [#allocation2]   ;;  %s4449_s19 = scalar_lea.hbm %s5779_s0, 2048 }
   0x3   :  { %s17_s16 = sshll.u32 %s4521_s15, 4  ;;  %p4450_p0 = scmp.ne.s32.totalorder %s5779_s0, %s4449_s19  ;;  %s18_s16 = int_to_ptr.vmem [resolvable:$true] %s17_s16 }
   0x4   :  { %p4453_p1 = scmp.lt.u32.totalorder %s4449_s19, %s5779_s0 }
   0x6   :  { %p4455_p2 = pnand %p4453_p1, %p4450_p0 }
   0x8   :  { %4458 = shalt.err (!%p4455_p2)
}
   0x9   :  { %s4459_s24 = scalar_lea.vmem %s18_s16, 2048  ;;  %p4464_p4 = scmp.lt.s32.totalorder %s18_s16, %s18_s16 }
   0xa   :  { %p4460_p3 = scmp.ne.s32.totalorder %s18_s16, %s4459_s24  ;;  %p4465_p5 = scmp.lt.s32.totalorder %s4459_s24, %s4459_s24 }
   0xc   :  { %p4466_p6 = por %p4465_p5, %p4464_p4 }
   0xe   :  { %p4467_p7 = pnand %p4466_p6, %p4460_p3 }
  0x10   :  { %4470 = shalt.err (!%p4467_p7)
}
  0x11   :  { %s4522_s25 = smov 128   ;;  %s4523_s26 = smov 8  }
  0x12   :  { %23 = dma.hbm_to_vmem [thread:$0]  %s5779_s0, 2048, %s18_s16, [#allocation3], %s4522_s25, %s4522_s25, %s4523_s26  }
  0x13   :  { %s4524_s29 = smov [#allocation5]   ;;  %s4471_s7 = scalar_lea.hbm %s5780_s1, 2048 }
  0x14   :  { %s29_s30 = sshll.u32 %s4524_s29, 4  ;;  %p4472_p8 = scmp.ne.s32.totalorder %s5780_s1, %s4471_s7  ;;  %s30_s30 = int_to_ptr.vmem [resolvable:$true] %s29_s30 }
  0x15   :  { %p4475_p9 = scmp.lt.u32.totalorder %s4471_s7, %s5780_s1 }
  0x17   :  { %p4477_p10 = pnand %p4475_p9, %p4472_p8 }
  0x19   :  { %4480 = shalt.err (!%p4477_p10)
}
  0x1a   :  { %s4481_s12 = scalar_lea.vmem %s30_s30, 2048  ;;  %p4486_p12 = scmp.lt.s32.totalorder %s30_s30, %s30_s30 }
  0x1b   :  { %p4482_p11 = scmp.ne.s32.totalorder %s30_s30, %s4481_s12  ;;  %p4487_p13 = scmp.lt.s32.totalorder %s4481_s12, %s4481_s12 }
  0x1d   :  { %p4488_p0 = por %p4487_p13, %p4486_p12 }
  0x1f   :  { %p4489_p1 = pnand %p4488_p0, %p4482_p11 }
  0x21   :  { %4492 = shalt.err (!%p4489_p1)
}
  0x22   :  { %35 = dma.hbm_to_vmem [thread:$0]  %s5780_s1, 2048, %s30_s30, [#allocation6], %s4522_s25, %s4522_s25, %s4523_s26  }
  0x23   :  { %4515 = dma.done.wait [#allocation3], 2048  }
  0x24   :  { %4516 = vsyncadd [#allocation3], 4294965248 }
  0x25   :  { %4517 = dma.done.wait [#allocation6], 2048  }
  0x26   :  { %4518 = vsyncadd [#allocation6], 4294965248  ;;  %v62_v0 = vld [vmem:[#allocation5] sm:$0xff]  ;;  %v63_v1 = vld [vmem:[#allocation5 + $0x8] sm:$0xff] }
  0x27   :  { %v64_v2 = vld [vmem:[#allocation5 + $0x10] sm:$0xff]  ;;  %v79_v3 = vand.u32 4294901760, %v62_v0  ;;  %v82_v4 = vand.u32 4294901760, %v63_v1  ;;  %v65_v5 = vld [vmem:[#allocation5 + $0x18] sm:$0xff]  ;;  %v4581_v7 = vld [vmem:[#allocation5 + $0x20] sm:$0xff] }
  0x28   :  { %v85_v6 = vand.u32 4294901760, %v64_v2  ;;  %v4583_v8 = vld [vmem:[#allocation5 + $0x28] sm:$0xff]  ;;  %v88_v9 = vand.u32 4294901760, %v65_v5  ;;  %v91_v11 = vand.u32 4294901760, %v4581_v7  ;;  %v4591_v14 = vld [vmem:[#allocation5 + $0x30] sm:$0xff]  ;;  %v4593_v15 = vld [vmem:[#allocation5 + $0x38] sm:$0xff] }
  0x29   :  { %v4585_v10 = vpack.c.bf16 %v82_v4, %v79_v3  ;;  %v94_v12 = vand.u32 4294901760, %v4583_v8  ;;  %v4596_v16 = vld [vmem:[#allocation2] sm:$0xff]  ;;  %v4598_v17 = vld [vmem:[#allocation2 + $0x8] sm:$0xff]  ;;  %v97_v20 = vand.u32 4294901760, %v4591_v14  ;;  %v100_v21 = vand.u32 4294901760, %v4593_v15  ;;  %v4627_v26 = vld [vmem:[#allocation2 + $0x10] sm:$0xff] }
  0x2a   :  { %v4589_v13 = vpack.c.bf16 %v88_v9, %v85_v6  ;;  %5904 = vst [vmem:[#allocation13_spill] sm:$0xff] %v4596_v16  ;;  %5905 = vst [vmem:[#allocation14_spill] sm:$0xff] %v4598_v17  ;;  %v4603_v18 = vand.u32 4294901760, %v4596_v16  ;;  %v4615_v22 = vld [vmem:[#allocation5 + $0x40] sm:$0xff]  ;;  %v4618_v23 = vld [vmem:[#allocation5 + $0x48] sm:$0xff]  ;;  %v4625_v25 = vand.u32 4294901760, %v4598_v17  ;;  %v4645_v33 = vsub.f32 %v62_v0, %v79_v3 }
  0x2b   :  { %5902 = vst [vmem:[#allocation11_spill] sm:$0xff] %v4585_v10  ;;  %3853 = vmatprep.subr.bf16.mxu0 %v4585_v10  ;;  %4045 = vmatprep.subr.bf16.mxu1 %v4585_v10  ;;  %v4611_v19 = vpack.c.bf16 %v94_v12, %v91_v11  ;;  %5908 = vst [vmem:[#allocation17_spill] sm:$0xff] %v4627_v26  ;;  %v4629_v27 = vld [vmem:[#allocation2 + $0x18] sm:$0xff]  ;;  %v103_v28 = vand.u32 4294901760, %v4615_v22  ;;  %v4640_v30 = vpack.c.bf16 %v100_v21, %v97_v20  ;;  %v4643_v32 = vld [vmem:[#allocation5 + $0x50] sm:$0xff] }
  0x2c   :  { %5903 = vst [vmem:[#allocation12_spill] sm:$0xff] %v4589_v13  ;;  %3855 = vmatpush3.bf16.msra.mxu0 %v4585_v10  ;;  %4047 = vmatpush3.bf16.msra.mxu1 %v4585_v10  ;;  %v4622_v24 = vsub.f32 %v4596_v16, %v4603_v18  ;;  %5909 = vst [vmem:[#allocation18_spill] sm:$0xff] %v4629_v27  ;;  %v5797_v31 = vand.u32 4294901760, %v4618_v23  ;;  %v4647_v34 = vsub.f32 %v63_v1, %v82_v4  ;;  %v4650_v35 = vld [vmem:[#allocation5 + $0x58] sm:$0xff]  ;;  %v4669_v42 = vld [vmem:[#allocation5 + $0x60] sm:$0xff] }
  0x2d   :  { %3857 = vmatprep.subr.bf16.mxu0 %v4589_v13  ;;  %5906 = vst [vmem:[#allocation15_spill] sm:$0xff] %v4611_v19  ;;  %4049 = vmatprep.subr.bf16.mxu1 %v4589_v13  ;;  %5910 = vst [vmem:[#allocation19_spill] sm:$0xff] %v4640_v30  ;;  %v4657_v37 = vsub.f32 %v4598_v17, %v4625_v25  ;;  %v4660_v38 = vand.u32 4294901760, %v4627_v26  ;;  %v4663_v39 = vand.u32 4294901760, %v4629_v27  ;;  %v5790_v41 = vand.u32 4294901760, %v4643_v32  ;;  %v4671_v43 = vld [vmem:[#allocation5 + $0x68] sm:$0xff] }
  0x2e   :  { %5907 = vst [vmem:[#allocation16_spill] sm:$0xff] %v4622_v24  ;;  %v5785_v29 = vand.u32 4294901760, %v4622_v24  ;;  %v4665_v40 = vsub.f32 %v64_v2, %v85_v6  ;;  %v4679_v45 = vpack.c.bf16 %v5797_v31, %v103_v28  ;;  %v5789_v46 = vand.u32 4294901760, %v4650_v35  ;;  %v4682_v47 = vld [vmem:[#allocation5 + $0x70] sm:$0xff]  ;;  %v4687_v50 = vld [vmem:[#allocation2 + $0x20] sm:$0xff]  ;;  %v4689_v51 = vld [vmem:[#allocation2 + $0x28] sm:$0xff] }
  0x2f   :  { %5911 = vst [vmem:[#allocation20_spill] sm:$0xff] %v4657_v37  ;;  %v5788_v48 = vand.u32 4294901760, %v4645_v33  ;;  %v4685_v49 = vsub.f32 %v65_v5, %v88_v9  ;;  %5913 = vst [vmem:[#allocation22_spill] sm:$0xff] %v4687_v50  ;;  %v4692_v52 = vld [vmem:[#allocation5 + $0x78] sm:$0xff]  ;;  %v5784_v53 = vand.u32 4294901760, %v4657_v37  ;;  %v5786_v54 = vand.u32 4294901760, %v4647_v34 }
  0x30   :  { %3859 = vmatpush3.bf16.msra.mxu0 %v4589_v13  ;;  %4051 = vmatpush3.bf16.msra.mxu1 %v4589_v13  ;;  %v162_v36 = vsub.f32 %v4622_v24, %v5785_v29  ;;  %5912 = vst [vmem:[#allocation21_spill] sm:$0xff] %v4679_v45  ;;  %5914 = vst [vmem:[#allocation23_spill] sm:$0xff] %v4689_v51  ;;  %v4698_v55 = vsub.f32 %v4627_v26, %v4660_v38  ;;  %v5795_v57 = vand.u32 4294901760, %v4669_v42  ;;  %v4728_v3 = vld [vmem:[#allocation2 + $0x30] sm:$0xff] }
  0x31   :  { %3861 = vmatprep.subr.bf16.mxu0 %v4611_v19  ;;  %4053 = vmatprep.subr.bf16.mxu1 %v4611_v19  ;;  %v4702_v56 = vsub.f32 %v4629_v27, %v4663_v39  ;;  %v5787_v58 = vand.u32 4294901760, %v4665_v40  ;;  %v5791_v59 = vand.u32 4294901760, %v4671_v43  ;;  %v5793_v60 = vand.u32 4294901760, %v4682_v47  ;;  %5918 = vst [vmem:[#allocation27_spill] sm:$0xff] %v4728_v3 }
  0x32   :  { %v163_v44 = vand.u32 4294901760, %v162_v36  ;;  %5915 = vst [vmem:[#allocation24_spill] sm:$0xff] %v4698_v55  ;;  %v4710_v61 = vand.u32 4294901760, %v4687_v50  ;;  %v4713_v62 = vand.u32 4294901760, %v4689_v51  ;;  %v4721_v63 = vpack.c.bf16 %v5789_v46, %v5790_v41 }
  0x33   :  { %5916 = vst [vmem:[#allocation25_spill] sm:$0xff] %v4702_v56  ;;  %v5792_v0 = vand.u32 4294901760, %v4692_v52  ;;  %v323_v1 = vsub.f32 %v4645_v33, %v5788_v48  ;;  %v5794_v2 = vand.u32 4294901760, %v4685_v49  ;;  %v4734_v4 = vsub.f32 %v4657_v37, %v5784_v53 }
  0x34   :  { %3863 = vmatpush3.bf16.msra.mxu0 %v4611_v19  ;;  %4055 = vmatpush3.bf16.msra.mxu1 %v4611_v19  ;;  %5917 = vst [vmem:[#allocation26_spill] sm:$0xff] %v4721_v63  ;;  %v330_v5 = vsub.f32 %v4647_v34, %v5786_v54  ;;  %v5796_v6 = vand.u32 4294901760, %v4698_v55  ;;  %v5798_v9 = vand.u32 4294901760, %v4702_v56  ;;  %v337_v36 = vsub.f32 %v4665_v40, %v5787_v58 }
  0x35   :  { %3865 = vmatprep.subr.bf16.mxu0 %v4640_v30  ;;  %4057 = vmatprep.subr.bf16.mxu1 %v4640_v30  ;;  %v4752_v53 = vsub.f32 %v4583_v8, %v94_v12  ;;  %v4757_v29 = vsub.f32 %v4687_v50, %v4710_v61  ;;  %v4761_v54 = vsub.f32 %v4689_v51, %v4713_v62  ;;  %v4764_v58 = vand.u32 4294901760, %v4728_v3 }
  0x36   :  { %3212 = vmatprep.mubr.f32.mxu0 %v163_v44  ;;  %v4747_v44 = vsub.f32 %v4581_v7, %v91_v11  ;;  %v4766_v7 = vld [vmem:[#allocation2 + $0x38] sm:$0xff]  ;;  %v4774_v8 = vpack.c.bf16 %v5791_v59, %v5795_v57  ;;  %v4780_v11 = vpack.c.bf16 %v5792_v0, %v5793_v60  ;;  %v324_v12 = vand.u32 4294901760, %v323_v1  ;;  %v4797_v1 = vld [vmem:[#allocation2 + $0x40] sm:$0xff]  ;;  %v4799_v60 = vld [vmem:[#allocation2 + $0x48] sm:$0xff] }
  0x37   :  { %5919 = vst [vmem:[#allocation28_spill] sm:$0xff] %v4757_v29  ;;  %5920 = vst [vmem:[#allocation29_spill] sm:$0xff] %v4761_v54  ;;  %v344_v48 = vsub.f32 %v4685_v49, %v5794_v2  ;;  %v331_v41 = vand.u32 4294901760, %v330_v5  ;;  %v4790_v59 = vsub.f32 %v4698_v55, %v5796_v6  ;;  %v4795_v0 = vsub.f32 %v4702_v56, %v5798_v9 }
  0x38   :  { %3867 = vmatpush3.bf16.msra.mxu0 %v4640_v30  ;;  %4059 = vmatpush3.bf16.msra.mxu1 %v4640_v30  ;;  %5921 = vst [vmem:[#allocation30_spill] sm:$0xff] %v4766_v7  ;;  %5922 = vst [vmem:[#allocation31_spill] sm:$0xff] %v4774_v8  ;;  %v338_v2 = vand.u32 4294901760, %v337_v36  ;;  %v4804_v5 = vand.u32 4294901760, %v4766_v7  ;;  %v4811_v9 = vsub.f32 %v4728_v3, %v4764_v58  ;;  %v4826_v31 = vand.u32 4294901760, %v4797_v1 }
  0x39   :  { %3869 = vmatprep.subr.bf16.mxu0 %v4679_v45  ;;  %4061 = vmatprep.subr.bf16.mxu1 %v4679_v45  ;;  %5923 = vst [vmem:[#allocation32_spill] sm:$0xff] %v4780_v11  ;;  %5924 = vst [vmem:[#allocation33_spill] sm:$0xff] %v4797_v1  ;;  %v4816_v36 = vsub.f32 %v4591_v14, %v97_v20  ;;  %v345_v46 = vand.u32 4294901760, %v344_v48  ;;  %v4823_v6 = vsub.f32 %v4593_v15, %v100_v21 }
  0x3a   :  { %5925 = vst [vmem:[#allocation34_spill] sm:$0xff] %v4799_v60  ;;  %5926 = vst [vmem:[#allocation35_spill] sm:$0xff] %v4811_v9  ;;  %v4829_v57 = vand.u32 4294901760, %v4799_v60  ;;  %v4832_v14 = vpack.c.bf16 %v331_v41, %v324_v12  ;;  %v183_v20 = vand.u32 4294901760, %v4790_v59  ;;  %v4838_v48 = vsub.f32 %v4615_v22, %v103_v28  ;;  %v4856_v22 = vld [vmem:[#allocation2 + $0x50] sm:$0xff] }
  0x3b   :  { %v5928_v15 = vand.u32 4294901760, %v4618_v23  ;;  %v5929_v50 = vand.u32 4294901760, %v4747_v44  ;;  %v5930_v41 = vand.u32 4294901760, %v4752_v53  ;;  %v4854_v12 = vsub.f32 %v4766_v7, %v4804_v5  ;;  %5932 = vst [vmem:[#allocation38_spill] sm:$0xff] %v4856_v22 }
  0x3c   :  { %3871 = vmatpush3.bf16.msra.mxu0 %v4679_v45  ;;  %4063 = vmatpush3.bf16.msra.mxu1 %v4679_v45  ;;  %5927 = vst [vmem:[#allocation36_spill] sm:$0xff] %v4832_v14  ;;  %v4873_v7 = vpack.c.bf16 %v345_v46, %v338_v2  ;;  %v4888_v27 = vand.u32 4294901760, %v4856_v22  ;;  %v4890_v46 = vld [vmem:[#allocation2 + $0x58] sm:$0xff]  ;;  %v5939_v2 = vand.u32 4294901760, %v4643_v32  ;;  %v5940_v17 = vand.u32 4294901760, %v4650_v35 }
  0x3d   :  { %3873 = vmatprep.subr.bf16.mxu0 %v4721_v63  ;;  %4065 = vmatprep.subr.bf16.mxu1 %v4721_v63  ;;  %v4843_v21 = vsub.f32 %v4618_v23, %v5928_v15  ;;  %v351_v51 = vsub.f32 %v4747_v44, %v5929_v50  ;;  %v358_v59 = vsub.f32 %v4752_v53, %v5930_v41  ;;  %v5933_v23 = vand.u32 4294901760, %v4757_v29 }
  0x3e   :  { %5931 = vst [vmem:[#allocation37_spill] sm:$0xff] %v4854_v12  ;;  %v5934_v15 = vand.u32 4294901760, %v4761_v54  ;;  %5935 = vst [vmem:[#allocation39_spill] sm:$0xff] %v4873_v7  ;;  %v4895_v26 = vsub.f32 %v4643_v32, %v5939_v2  ;;  %v4901_v3 = vsub.f32 %v4650_v35, %v5940_v17  ;;  %v4914_v2 = vld [vmem:[#allocation2 + $0x60] sm:$0xff]  ;;  %v5944_v17 = vand.u32 4294901760, %v4823_v6 }
  0x3f   :  { %v4862_v28 = vsub.f32 %v4757_v29, %v5933_v23  ;;  %v4878_v23 = vsub.f32 %v4797_v1, %v4826_v31  ;;  %5938 = vst [vmem:[#allocation42_spill] sm:$0xff] %v4890_v46  ;;  %v352_v1 = vand.u32 4294901760, %v351_v51  ;;  %v359_v16 = vand.u32 4294901760, %v358_v59  ;;  %5943 = vst [vmem:[#allocation43_spill] sm:$0xff] %v4914_v2 }
  0x40   :  { %3875 = vmatpush3.bf16.msra.mxu0 %v4721_v63  ;;  %4067 = vmatpush3.bf16.msra.mxu1 %v4721_v63  ;;  %v4867_v50 = vsub.f32 %v4761_v54, %v5934_v15  ;;  %v4882_v15 = vsub.f32 %v4799_v60, %v4829_v57  ;;  %v5941_v63 = vand.u32 4294901760, %v4811_v9  ;;  %v5942_v51 = vand.u32 4294901760, %v4816_v36 }
  0x41   :  { %3877 = vmatprep.subr.bf16.mxu0 %v4774_v8  ;;  %4069 = vmatprep.subr.bf16.mxu1 %v4774_v8  ;;  %5936 = vst [vmem:[#allocation40_spill] sm:$0xff] %v4878_v23  ;;  %v203_v41 = vand.u32 4294901760, %v4862_v28  ;;  %v372_v35 = vsub.f32 %v4823_v6, %v5944_v17  ;;  %v4935_v17 = vsub.f32 %v4856_v22, %v4888_v27  ;;  %v4947_v19 = vand.u32 4294901760, %v4914_v2  ;;  %v4951_v22 = vld [vmem:[#allocation2 + $0x68] sm:$0xff] }
  0x42   :  { %5937 = vst [vmem:[#allocation41_spill] sm:$0xff] %v4882_v15  ;;  %v4909_v32 = vsub.f32 %v4811_v9, %v5941_v63  ;;  %v365_v59 = vsub.f32 %v4816_v36, %v5942_v51  ;;  %v4924_v63 = vand.u32 4294901760, %v4890_v46  ;;  %v5945_v51 = vand.u32 4294901760, %v4838_v48  ;;  %5951 = vst [vmem:[#allocation46_spill] sm:$0xff] %v4951_v22 }
  0x43   :  { %5947 = vst [vmem:[#allocation44_spill] sm:$0xff] %v4935_v17  ;;  %v4940_v30 = vpack.c.bf16 %v359_v16, %v352_v1  ;;  %v5950_v9 = vand.u32 4294901760, %v4854_v12  ;;  %v5952_v16 = vand.u32 4294901760, %v4669_v42  ;;  %v5962_v37 = vand.u32 4294901760, %v4935_v17 }
  0x44   :  { %3879 = vmatpush3.bf16.msra.mxu0 %v4774_v8  ;;  %4071 = vmatpush3.bf16.msra.mxu1 %v4774_v8  ;;  %v213_v8 = vand.u32 4294901760, %v4867_v50  ;;  %v379_v60 = vsub.f32 %v4838_v48, %v5945_v51  ;;  %v5948_v50 = vand.u32 4294901760, %v4734_v4  ;;  %v399_v51 = vand.u32 4294901760, %v4901_v3 }
  0x45   :  { %3881 = vmatprep.subr.bf16.mxu0 %v4780_v11  ;;  %4073 = vmatprep.subr.bf16.mxu1 %v4780_v11  ;;  %5949 = vst [vmem:[#allocation45_spill] sm:$0xff] %v4940_v30  ;;  %v232_v54 = vsub.f32 %v4854_v12, %v5950_v9  ;;  %v366_v28 = vand.u32 4294901760, %v365_v59  ;;  %v4956_v4 = vsub.f32 %v4669_v42, %v5952_v16  ;;  %v5953_v9 = vand.u32 4294901760, %v4671_v43  ;;  %v4976_v16 = vld [vmem:[#allocation2 + $0x70] sm:$0xff] }
  0x46   :  { %v5955_v59 = vand.u32 4294901760, %v4882_v15  ;;  %v4974_v42 = vsub.f32 %v4890_v46, %v4924_v63  ;;  %5956 = vst [vmem:[#allocation47_spill] sm:$0xff] %v4976_v16  ;;  %v4987_v46 = vsub.f32 %v4914_v2, %v4947_v19  ;;  %v5973_v24 = vand.u32 4294901760, %v4816_v36 }
  0x47   :  { %v4961_v1 = vsub.f32 %v4671_v43, %v5953_v9  ;;  %v380_v43 = vand.u32 4294901760, %v379_v60 }
  0x48   :  { %3883 = vmatpush3.bf16.msra.mxu0 %v4780_v11  ;;  %4075 = vmatpush3.bf16.msra.mxu1 %v4780_v11  ;;  %v5946_v11 = vand.u32 4294901760, %v4843_v21 }
  0x49   :  { %3885 = vmatprep.subr.bf16.mxu0 %v4832_v14  ;;  %4077 = vmatprep.subr.bf16.mxu1 %v4832_v14  ;;  %v413_v60 = vand.u32 4294901760, %v4961_v1 }
  0x4a   :  { %v386_v45 = vsub.f32 %v4843_v21, %v5946_v11  ;;  %v223_v11 = vand.u32 4294901760, %v4909_v32 }
  0x4b   :  { %3213 = vmatmul.mubr.f32.vlgmr.msra.gmra.mrb[0].mxu0 %v5948_v50  ;;  %v373_v50 = vand.u32 4294901760, %v372_v35  ;;  %v5957_v35 = vand.u32 4294901760, %v4895_v26 }
  0x4c   :  { %3887 = vmatpush3.bf16.msra.mxu0 %v4832_v14  ;;  %3215 = vmatprep.mubr.f32.mxu0 %v183_v20  ;;  %v5954_v20 = vand.u32 4294901760, %v4878_v23  ;;  %v4970_v14 = vsub.f32 %v4882_v15, %v5955_v59  ;;  %v387_v9 = vand.u32 4294901760, %v386_v45  ;;  %v400_v59 = vsub.f32 %v4901_v3, %v399_v51 }
  0x4d   :  { %3889 = vmatprep.subr.bf16.mxu0 %v4873_v7  ;;  %v393_v29 = vsub.f32 %v4895_v26, %v5957_v35  ;;  %v4990_v15 = vand.u32 4294901760, %v4951_v22  ;;  %v406_v45 = vand.u32 4294901760, %v4956_v4  ;;  %v5960_v35 = vand.u32 4294901760, %v4682_v47 }
  0x4e   :  { %v242_v32 = vsub.f32 %v4878_v23, %v5954_v20  ;;  %v5958_v20 = vand.u32 4294901760, %v4795_v0  ;;  %v233_v23 = vand.u32 4294901760, %v232_v54  ;;  %v4996_v0 = vand.u32 4294901760, %v4976_v16  ;;  %v4998_v54 = vld [vmem:[#allocation2 + $0x78] sm:$0xff] }
  0x4f   :  { %5959 = vst [vmem:[#allocation48_spill] sm:$0xff] %v4998_v54  ;;  %v5006_v12 = vpack.c.bf16 %v373_v50, %v366_v28  ;;  %v253_v13 = vand.u32 4294901760, %v4970_v14  ;;  %v5015_v55 = vpack.c.bf16 %v387_v9, %v380_v43  ;;  %v401_v28 = vand.u32 4294901760, %v400_v59 }
  0x50   :  { %3216 = vmatmul.mubr.f32.gmra.mrb[2].mxu0 %v5958_v20  ;;  %v5003_v20 = vsub.f32 %v4682_v47, %v5960_v35  ;;  %v243_v2 = vand.u32 4294901760, %v242_v32  ;;  %v262_v47 = vsub.f32 %v4935_v17, %v5962_v37  ;;  %v394_v35 = vand.u32 4294901760, %v393_v29 }
  0x51   :  { %3891 = vmatpush3.bf16.msra.mxu0 %v4873_v7  ;;  %3218 = vmatprep.mubr.f32.mxu0 %v203_v41  ;;  %v5961_v7 = vand.u32 4294901760, %v4692_v52  ;;  %v5023_v32 = vsub.f32 %v4951_v22, %v4990_v15  ;;  %v414_v14 = vsub.f32 %v4961_v1, %v413_v60  ;;  %v5033_v29 = vsub.f32 %v4976_v16, %v4996_v0 }
  0x52   :  { %3893 = vmatprep.subr.bf16.mxu0 %v4940_v30  ;;  %v420_v37 = vand.u32 4294901760, %v5003_v20  ;;  %v5963_v43 = vand.u32 4294901760, %v4645_v33  ;;  %v5964_v9 = vand.u32 4294901760, %v4647_v34  ;;  %v5967_v50 = vand.u32 4294901760, %v4685_v49 }
  0x53   :  { %v5012_v56 = vsub.f32 %v4692_v52, %v5961_v7  ;;  %v5026_v52 = vand.u32 4294901760, %v4998_v54  ;;  %v407_v7 = vsub.f32 %v4956_v4, %v406_v45  ;;  %v5969_v16 = vand.u32 4294901760, %v4747_v44 }
  0x54   :  { %3219 = vmatmul.mubr.f32.gmra.mrb[4].mxu0 %v213_v8  ;;  %v5042_v59 = vpack.c.bf16 %v5964_v9, %v5963_v43  ;;  %v5970_v22 = vand.u32 4294901760, %v4752_v53  ;;  %v5972_v17 = vand.u32 4294901760, %v4974_v42  ;;  %v5974_v43 = vand.u32 4294901760, %v4823_v6 }
  0x55   :  { %3895 = vmatpush3.bf16.msra.mxu0 %v4940_v30  ;;  %3221 = vmatprep.mubr.f32.mxu0 %v223_v11  ;;  %v427_v8 = vand.u32 4294901760, %v5012_v56  ;;  %v5966_v11 = vand.u32 4294901760, %v4665_v40 }
  0x56   :  { %3897 = vmatprep.subr.bf16.mxu0 %v5006_v12  ;;  %5965 = vst [vmem:[#allocation49_spill] sm:$0xff] %v5042_v59  ;;  %v5054_v30 = vpack.c.bf16 %v5970_v22, %v5969_v16  ;;  %v272_v10 = vsub.f32 %v4974_v42, %v5972_v17  ;;  %v5063_v9 = vpack.c.bf16 %v5974_v43, %v5973_v24  ;;  %v5976_v59 = vand.u32 4294901760, %v4838_v48 }
  0x57   :  { %v5048_v41 = vpack.c.bf16 %v5967_v50, %v5966_v11  ;;  %v5977_v50 = vand.u32 4294901760, %v4843_v21  ;;  %v5078_v17 = vsub.f32 %v4998_v54, %v5026_v52  ;;  %v5082_v24 = vpack.c.bf16 %v427_v8, %v420_v37 }
  0x58   :  { %5971 = vst [vmem:[#allocation51_spill] sm:$0xff] %v5054_v30  ;;  %5975 = vst [vmem:[#allocation52_spill] sm:$0xff] %v5063_v9  ;;  %3222 = vmatmul.mubr.f32.gmra.mrb[6].mxu0 %v233_v23  ;;  %v5080_v30 = vpack.c.bf16 %v413_v60, %v406_v45  ;;  %v5085_v43 = vpack.c.bf16 %v401_v28, %v394_v35  ;;  %v415_v16 = vand.u32 4294901760, %v414_v14  ;;  %v273_v54 = vand.u32 4294901760, %v272_v10 }
  0x59   :  { %5968 = vst [vmem:[#allocation50_spill] sm:$0xff] %v5048_v41  ;;  %v5069_v11 = vpack.c.bf16 %v5977_v50, %v5976_v59  ;;  %v5979_v41 = vand.u32 4294901760, %v4895_v26  ;;  %5982 = vst [vmem:[#allocation56_spill] sm:$0xff] %v5082_v24  ;;  %3899 = vmatpush3.bf16.msra.mxu0 %v5006_v12  ;;  %3224 = vmatprep.mubr.f32.mxu0 %v243_v2  ;;  %v263_v59 = vand.u32 4294901760, %v262_v47  ;;  %v408_v50 = vand.u32 4294901760, %v407_v7 }
  0x5a   :  { %5981 = vst [vmem:[#allocation55_spill] sm:$0xff] %v5080_v30  ;;  %3901 = vmatprep.subr.bf16.mxu0 %v5015_v55  ;;  %v421_v45 = vsub.f32 %v5003_v20, %v420_v37  ;;  %v428_v60 = vsub.f32 %v5012_v56, %v427_v8  ;;  %v5984_v2 = vand.u32 4294901760, %v5023_v32  ;;  %v5861_v35 = vand.u32 4294901760, %v5078_v17 }
  0x5b   :  { %5978 = vst [vmem:[#allocation53_spill] sm:$0xff] %v5069_v11  ;;  %v5073_v22 = vpack.c.bf16 %v399_v51, %v5979_v41  ;;  %v5983_v51 = vand.u32 4294901760, %v4987_v46  ;;  %v5862_v41 = vand.u32 4294901760, %v5033_v29  ;;  %v5103_v14 = vpack.c.bf16 %v415_v16, %v408_v50  ;;  %v5995_v50 = vld [vmem:[#allocation19_spill] sm:$0xff] }
  0x5c   :  { %3225 = vmatmul.mubr.f32.gmra.mrb[8].mxu0 %v253_v13  ;;  %v292_v47 = vsub.f32 %v5023_v32, %v5984_v2  ;;  %v422_v13 = vand.u32 4294901760, %v421_v45  ;;  %v429_v10 = vand.u32 4294901760, %v428_v60  ;;  %v312_v8 = vsub.f32 %v5078_v17, %v5861_v35  ;;  %v5996_v45 = vld [vmem:[#allocation37_spill] sm:$0xff]  ;;  %v5997_v60 = vld [vmem:[#allocation40_spill] sm:$0xff] }
  0x5d   :  { %5980 = vst [vmem:[#allocation54_spill] sm:$0xff] %v5073_v22  ;;  %v282_v23 = vsub.f32 %v4987_v46, %v5983_v51  ;;  %3903 = vmatpush3.bf16.msra.mxu0 %v5015_v55  ;;  %3227 = vmatprep.mubr.f32.mxu0 %v263_v59  ;;  %v302_v7 = vsub.f32 %v5033_v29, %v5862_v41  ;;  %v5998_v2 = vld [vmem:[#allocation21_spill] sm:$0xff] }
  0x5e   :  { %3905 = vmatprep.subr.bf16.mxu0 %v5085_v43  ;;  %v293_v37 = vand.u32 4294901760, %v292_v47  ;;  %v5110_v51 = vpack.c.bf16 %v429_v10, %v422_v13  ;;  %v5123_v16 = vpack.c.bf16 %v4685_v49, %v4665_v40  ;;  %v5147_v40 = vpack.c.bf16 %v4843_v21, %v4838_v48  ;;  %v5990_v48 = vld [vmem:[#allocation25_spill] sm:$0xff]  ;;  %v5991_v21 = vld [vmem:[#allocation28_spill] sm:$0xff]  ;;  %v6002_v13 = vld [vmem:[#allocation31_spill] sm:$0xff] }
  0x5f   :  { %v283_v28 = vand.u32 4294901760, %v282_v23  ;;  %v303_v59 = vand.u32 4294901760, %v302_v7  ;;  %v313_v23 = vand.u32 4294901760, %v312_v8  ;;  %v5155_v49 = vpack.c.bf16 %v4901_v3, %v4895_v26  ;;  %v5985_v3 = vld [vmem:[#allocation16_spill] sm:$0xff]  ;;  %v5999_v47 = vld [vmem:[#allocation41_spill] sm:$0xff]  ;;  %v6001_v7 = vld [vmem:[#allocation26_spill] sm:$0xff] }
  0x60   :  { %3228 = vmatmul.mubr.f32.gmra.mrb[10].mxu0 %v273_v54  ;;  %v5116_v54 = vpack.c.bf16 %v4647_v34, %v4645_v33  ;;  %v5131_v33 = vpack.c.bf16 %v4752_v53, %v4747_v44  ;;  %v5139_v34 = vpack.c.bf16 %v4823_v6, %v4816_v36  ;;  %v5163_v53 = vpack.c.bf16 %v4961_v1, %v4956_v4  ;;  %v5986_v6 = vld [vmem:[#allocation11_spill] sm:$0xff]  ;;  %v5987_v44 = vld [vmem:[#allocation20_spill] sm:$0xff]  ;;  %v5993_v1 = vld [vmem:[#allocation29_spill] sm:$0xff] }
  0x61   :  { %3907 = vmatpush3.bf16.msra.mxu0 %v5085_v43  ;;  %3230 = vmatprep.mubr.f32.mxu0 %v283_v28  ;;  %v5171_v26 = vpack.c.bf16 %v5012_v56, %v5003_v20  ;;  %v5988_v56 = vld [vmem:[#allocation24_spill] sm:$0xff]  ;;  %v5992_v4 = vld [vmem:[#allocation15_spill] sm:$0xff]  ;;  %v6005_v8 = vld [vmem:[#allocation49_spill] sm:$0xff]  ;;  %v6009_v41 = vand.u32 4294901760, %v5990_v48 }
  0x62   :  { %3909 = vmatprep.subr.bf16.mxu0 %v5103_v14  ;;  %v5989_v36 = vld [vmem:[#allocation12_spill] sm:$0xff]  ;;  %v5994_v20 = vld [vmem:[#allocation35_spill] sm:$0xff]  ;;  %v6008_v35 = vld [vmem:[#allocation50_spill] sm:$0xff] }
  0x63   :  { %v6000_v28 = vld [vmem:[#allocation44_spill] sm:$0xff] }
  0x64   :  { %3231 = vmatmul.mubr.f32.gmra.mrb[12].mxu0 %v293_v37  ;;  %v6003_v10 = vld [vmem:[#allocation32_spill] sm:$0xff]  ;;  %v6004_v37 = vand.u32 4294901760, %v5985_v3 }
  0x65   :  { %3911 = vmatpush3.bf16.msra.mxu0 %v5103_v14  ;;  %3233 = vmatprep.mubr.f32.mxu0 %v303_v59  ;;  %v6006_v59 = vand.u32 4294901760, %v5987_v44 }
  0x66   :  { %3913 = vmatprep.subr.bf16.mxu0 %v5110_v51 }
  0x68   :  { %3234 = vmatmul.mubr.f32.gmra.mrb[14].mxu0 %v313_v23  ;;  %v6007_v23 = vand.u32 4294901760, %v5988_v56 }
  0x69   :  { %3915 = vmatpush3.bf16.msra.mxu0 %v5110_v51  ;;  %3268 = vmatprep.mubr.f32.mxu0 %v4603_v18 }
  0x6a   :  { %3917 = vmatprep.subr.bf16.mxu0 %v5116_v54 }
  0x6c   :  { %3269 = vmatmul.mubr.f32.vlgmr.msra.gmra.mrb[0].mxu0 %v4625_v25 }
  0x6d   :  { %3919 = vmatpush3.bf16.msra.mxu0 %v5116_v54  ;;  %3271 = vmatprep.mubr.f32.mxu0 %v4660_v38 }
  0x6e   :  { %3921 = vmatprep.subr.bf16.mxu0 %v5123_v16 }
  0x70   :  { %3272 = vmatmul.mubr.f32.gmra.mrb[2].mxu0 %v4663_v39 }
  0x71   :  { %3923 = vmatpush3.bf16.msra.mxu0 %v5123_v16  ;;  %3274 = vmatprep.mubr.f32.mxu0 %v4710_v61 }
  0x72   :  { %3925 = vmatprep.subr.bf16.mxu0 %v5131_v33 }
  0x74   :  { %3275 = vmatmul.mubr.f32.gmra.mrb[4].mxu0 %v4713_v62 }
  0x75   :  { %3927 = vmatpush3.bf16.msra.mxu0 %v5131_v33  ;;  %3277 = vmatprep.mubr.f32.mxu0 %v4764_v58 }
  0x76   :  { %3929 = vmatprep.subr.bf16.mxu0 %v5139_v34 }
  0x78   :  { %3278 = vmatmul.mubr.f32.gmra.mrb[6].mxu0 %v4804_v5 }
  0x79   :  { %3931 = vmatpush3.bf16.msra.mxu0 %v5139_v34  ;;  %3280 = vmatprep.mubr.f32.mxu0 %v4826_v31 }
  0x7a   :  { %3933 = vmatprep.subr.bf16.mxu0 %v5147_v40 }
  0x7c   :  { %3281 = vmatmul.mubr.f32.gmra.mrb[8].mxu0 %v4829_v57 }
  0x7d   :  { %3935 = vmatpush3.bf16.msra.mxu0 %v5147_v40  ;;  %3283 = vmatprep.mubr.f32.mxu0 %v4888_v27 }
  0x7e   :  { %3937 = vmatprep.subr.bf16.mxu0 %v5155_v49 }
  0x80   :  { %3284 = vmatmul.mubr.f32.gmra.mrb[10].mxu0 %v4924_v63 }
  0x81   :  { %3939 = vmatpush3.bf16.msra.mxu0 %v5155_v49  ;;  %3286 = vmatprep.mubr.f32.mxu0 %v4947_v19 }
  0x82   :  { %3941 = vmatprep.subr.bf16.mxu0 %v5163_v53 }
  0x84   :  { %3287 = vmatmul.mubr.f32.gmra.mrb[12].mxu0 %v4990_v15 }
  0x85   :  { %3943 = vmatpush3.bf16.msra.mxu0 %v5163_v53  ;;  %3289 = vmatprep.mubr.f32.mxu0 %v4996_v0 }
  0x86   :  { %3945 = vmatprep.subr.bf16.mxu0 %v5171_v26 }
  0x88   :  { %3290 = vmatmul.mubr.f32.gmra.mrb[14].mxu0 %v5026_v52 }
  0x89   :  { %3947 = vmatpush3.bf16.msra.mxu0 %v5171_v26  ;;  %3324 = vmatprep.mubr.f32.mxu0 %v5985_v3  ;;  %v6010_v3 = vand.u32 4294901760, %v5991_v21 }
  0x8a   :  { %3949 = vmatprep.subr.bf16.mxu0 %v5986_v6 }
  0x8c   :  { %3325 = vmatmul.mubr.f32.vlgmr.msra.gmra.mrb[0].mxu0 %v5987_v44  ;;  %v6012_v44 = vand.u32 4294901760, %v5993_v1 }
  0x8d   :  { %3951 = vmatpush3.bf16.msra.mxu0 %v5986_v6  ;;  %3327 = vmatprep.mubr.f32.mxu0 %v5988_v56  ;;  %v6013_v56 = vand.u32 4294901760, %v5994_v20 }
  0x8e   :  { %3953 = vmatprep.subr.bf16.mxu0 %v5989_v36 }
  0x90   :  { %3328 = vmatmul.mubr.f32.gmra.mrb[2].mxu0 %v5990_v48  ;;  %v6014_v48 = vand.u32 4294901760, %v5996_v45 }
  0x91   :  { %3955 = vmatpush3.bf16.msra.mxu0 %v5989_v36  ;;  %3330 = vmatprep.mubr.f32.mxu0 %v5991_v21  ;;  %v6016_v21 = vand.u32 4294901760, %v5999_v47 }
  0x92   :  { %3957 = vmatprep.subr.bf16.mxu0 %v5992_v4 }
  0x94   :  { %3331 = vmatmul.mubr.f32.gmra.mrb[4].mxu0 %v5993_v1  ;;  %v6017_v1 = vand.u32 4294901760, %v6000_v28 }
  0x95   :  { %3959 = vmatpush3.bf16.msra.mxu0 %v5992_v4  ;;  %3333 = vmatprep.mubr.f32.mxu0 %v5994_v20  ;;  %v6018_v20 = vand.u32 4294901760, %v4974_v42 }
  0x96   :  { %3961 = vmatprep.subr.bf16.mxu0 %v5995_v50 }
  0x98   :  { %3334 = vmatmul.mubr.f32.gmra.mrb[6].mxu0 %v5996_v45  ;;  %v6019_v45 = vand.u32 4294901760, %v4987_v46 }
  0x99   :  { %3963 = vmatpush3.bf16.msra.mxu0 %v5995_v50  ;;  %3336 = vmatprep.mubr.f32.mxu0 %v5997_v60 }
  0x9a   :  { %3965 = vmatprep.subr.bf16.mxu0 %v5998_v2 }
  0x9c   :  { %3337 = vmatmul.mubr.f32.gmra.mrb[8].mxu0 %v5999_v47  ;;  %v6021_v47 = vand.u32 4294901760, %v5033_v29 }
  0x9d   :  { %3967 = vmatpush3.bf16.msra.mxu0 %v5998_v2  ;;  %3339 = vmatprep.mubr.f32.mxu0 %v6000_v28 }
  0x9e   :  { %3969 = vmatprep.subr.bf16.mxu0 %v6001_v7 }
  0xa0   :  { %3340 = vmatmul.mubr.f32.gmra.mrb[10].mxu0 %v4974_v42  ;;  %v6022_v42 = vand.u32 4294901760, %v5078_v17 }
  0xa1   :  { %3971 = vmatpush3.bf16.msra.mxu0 %v6001_v7  ;;  %3342 = vmatprep.mubr.f32.mxu0 %v4987_v46 }
  0xa2   :  { %3973 = vmatprep.subr.bf16.mxu0 %v6002_v13 }
  0xa4   :  { %3343 = vmatmul.mubr.f32.gmra.mrb[12].mxu0 %v5023_v32 }
  0xa5   :  { %3975 = vmatpush3.bf16.msra.mxu0 %v6002_v13  ;;  %3345 = vmatprep.mubr.f32.mxu0 %v5033_v29 }
  0xa6   :  { %3977 = vmatprep.subr.bf16.mxu0 %v6003_v10 }
  0xa8   :  { %3346 = vmatmul.mubr.f32.gmra.mrb[14].mxu0 %v5078_v17 }
  0xa9   :  { %3979 = vmatpush3.bf16.msra.mxu0 %v6003_v10  ;;  %3380 = vmatprep.mubr.f32.mxu0 %v6004_v37  ;;  %v6011_v37 = vld [vmem:[#allocation51_spill] sm:$0xff] }
  0xaa   :  { %3981 = vmatprep.subr.bf16.mxu0 %v6005_v8 }
  0xac   :  { %3381 = vmatmul.mubr.f32.vlgmr.msra.gmra.mrb[0].mxu0 %v6006_v59 }
  0xad   :  { %3983 = vmatpush3.bf16.msra.mxu0 %v6005_v8  ;;  %3383 = vmatprep.mubr.f32.mxu0 %v6007_v23  ;;  %v6031_v23 = vld [vmem:[#allocation23_spill] sm:$0xff] }
  0xae   :  { %3985 = vmatprep.subr.bf16.mxu0 %v6008_v35 }
  0xb0   :  { %3384 = vmatmul.mubr.f32.gmra.mrb[2].mxu0 %v6009_v41  ;;  %v6015_v41 = vand.u32 4294901760, %v5997_v60  ;;  %v6020_v60 = vand.u32 4294901760, %v5023_v32 }
  0xb1   :  { %3987 = vmatpush3.bf16.msra.mxu0 %v6008_v35  ;;  %3386 = vmatprep.mubr.f32.mxu0 %v6010_v3 }
  0xb2   :  { %3989 = vmatprep.subr.bf16.mxu0 %v6011_v37 }
  0xb4   :  { %3387 = vmatmul.mubr.f32.gmra.mrb[4].mxu0 %v6012_v44 }
  0xb5   :  { %3991 = vmatpush3.bf16.msra.mxu0 %v6011_v37  ;;  %3389 = vmatprep.mubr.f32.mxu0 %v6013_v56 }
  0xb6   :  { %3993 = vmatprep.subr.bf16.mxu0 %v5063_v9 }
  0xb8   :  { %3390 = vmatmul.mubr.f32.gmra.mrb[6].mxu0 %v6014_v48 }
  0xb9   :  { %3995 = vmatpush3.bf16.msra.mxu0 %v5063_v9  ;;  %3392 = vmatprep.mubr.f32.mxu0 %v6015_v41  ;;  %v6033_v41 = vld [vmem:[#allocation22_spill] sm:$0xff]  ;;  %v6056_v9 = vld [vmem:[#allocation47_spill] sm:$0xff] }
  0xba   :  { %3997 = vmatprep.subr.bf16.mxu0 %v5069_v11 }
  0xbc   :  { %3393 = vmatmul.mubr.f32.gmra.mrb[8].mxu0 %v6016_v21 }
  0xbd   :  { %3999 = vmatpush3.bf16.msra.mxu0 %v5069_v11  ;;  %3395 = vmatprep.mubr.f32.mxu0 %v6017_v1 }
  0xbe   :  { %4001 = vmatprep.subr.bf16.mxu0 %v5073_v22 }
  0xc0   :  { %3396 = vmatmul.mubr.f32.gmra.mrb[10].mxu0 %v6018_v20 }
  0xc1   :  { %4003 = vmatpush3.bf16.msra.mxu0 %v5073_v22  ;;  %3398 = vmatprep.mubr.f32.mxu0 %v6019_v45 }
  0xc2   :  { %4005 = vmatprep.subr.bf16.mxu0 %v5080_v30 }
  0xc4   :  { %3399 = vmatmul.mubr.f32.gmra.mrb[12].mxu0 %v6020_v60 }
  0xc5   :  { %4007 = vmatpush3.bf16.msra.mxu0 %v5080_v30  ;;  %3401 = vmatprep.mubr.f32.mxu0 %v6021_v47  ;;  %v6052_v30 = vld [vmem:[#allocation43_spill] sm:$0xff] }
  0xc6   :  { %4009 = vmatprep.subr.bf16.mxu0 %v5082_v24 }
  0xc8   :  { %3402 = vmatmul.mubr.f32.gmra.mrb[14].mxu0 %v6022_v42 }
  0xc9   :  { %4011 = vmatpush3.bf16.msra.mxu0 %v5082_v24  ;;  %3436 = vmatprep.mubr.f32.mxu0 %v4603_v18 }
  0xca   :  { %4013 = vmatprep.subr.bf16.mxu0 %v5986_v6 }
  0xcc   :  { %3437 = vmatmul.mubr.f32.vlgmr.msra.gmra.mrb[0].mxu0 %v4625_v25 }
  0xcd   :  { %4015 = vmatpush3.bf16.msra.mxu0 %v5986_v6  ;;  %3439 = vmatprep.mubr.f32.mxu0 %v4660_v38 }
  0xce   :  { %4017 = vmatprep.subr.bf16.mxu0 %v5989_v36 }
  0xd0   :  { %3440 = vmatmul.mubr.f32.gmra.mrb[2].mxu0 %v4663_v39 }
  0xd1   :  { %4019 = vmatpush3.bf16.msra.mxu0 %v5989_v36  ;;  %3442 = vmatprep.mubr.f32.mxu0 %v4710_v61 }
  0xd2   :  { %4021 = vmatprep.subr.bf16.mxu0 %v5992_v4 }
  0xd4   :  { %3443 = vmatmul.mubr.f32.gmra.mrb[4].mxu0 %v4713_v62 }
  0xd5   :  { %4023 = vmatpush3.bf16.msra.mxu0 %v5992_v4  ;;  %3445 = vmatprep.mubr.f32.mxu0 %v4764_v58 }
  0xd6   :  { %4025 = vmatprep.subr.bf16.mxu0 %v5995_v50 }
  0xd8   :  { %3446 = vmatmul.mubr.f32.gmra.mrb[6].mxu0 %v4804_v5 }
  0xd9   :  { %4027 = vmatpush3.bf16.msra.mxu0 %v5995_v50  ;;  %3448 = vmatprep.mubr.f32.mxu0 %v4826_v31 }
  0xda   :  { %4029 = vmatprep.subr.bf16.mxu0 %v5998_v2 }
  0xdc   :  { %3449 = vmatmul.mubr.f32.gmra.mrb[8].mxu0 %v4829_v57 }
  0xdd   :  { %4031 = vmatpush3.bf16.msra.mxu0 %v5998_v2  ;;  %3451 = vmatprep.mubr.f32.mxu0 %v4888_v27 }
  0xde   :  { %4033 = vmatprep.subr.bf16.mxu0 %v6001_v7 }
  0xe0   :  { %3452 = vmatmul.mubr.f32.gmra.mrb[10].mxu0 %v4924_v63 }
  0xe1   :  { %4035 = vmatpush3.bf16.msra.mxu0 %v6001_v7  ;;  %3454 = vmatprep.mubr.f32.mxu0 %v4947_v19 }
  0xe2   :  { %4037 = vmatprep.subr.bf16.mxu0 %v6002_v13 }
  0xe4   :  { %3455 = vmatmul.mubr.f32.gmra.mrb[12].mxu0 %v4990_v15 }
  0xe5   :  { %4039 = vmatpush3.bf16.msra.mxu0 %v6002_v13  ;;  %3457 = vmatprep.mubr.f32.mxu0 %v4996_v0 }
  0xe6   :  { %4041 = vmatprep.subr.bf16.mxu0 %v6003_v10 }
  0xe8   :  { %3458 = vmatmul.mubr.f32.gmra.mrb[14].mxu0 %v5026_v52 }
  0xe9   :  { %4043 = vmatpush3.bf16.msra.mxu0 %v6003_v10  ;;  %3492 = vmatprep.mubr.f32.mxu0 %v4603_v18 }
  0xec   :  { %3493 = vmatmul.mubr.f32.vlgmr.msra.gmra.mrb[0].mxu0 %v4625_v25  ;;  %v6023_v25 = vld [vmem:[#allocation14_spill] sm:$0xff] }
  0xed   :  { %3495 = vmatprep.mubr.f32.mxu0 %v4660_v38 }
  0xf0   :  { %3496 = vmatmul.mubr.f32.gmra.mrb[2].mxu0 %v4663_v39 }
  0xf1   :  { %3498 = vmatprep.mubr.f32.mxu0 %v4710_v61 }
  0xf4   :  { %3499 = vmatmul.mubr.f32.gmra.mrb[4].mxu0 %v4713_v62  ;;  %v6027_v62 = vld [vmem:[#allocation18_spill] sm:$0xff] }
  0xf5   :  { %3501 = vmatprep.mubr.f32.mxu0 %v4764_v58 }
  0xf8   :  { %3502 = vmatmul.mubr.f32.gmra.mrb[6].mxu0 %v4804_v5 }
  0xf9   :  { %3504 = vmatprep.mubr.f32.mxu0 %v4826_v31  ;;  %v6025_v31 = vld [vmem:[#allocation13_spill] sm:$0xff] }
  0xfc   :  { %3505 = vmatmul.mubr.f32.gmra.mrb[8].mxu0 %v4829_v57 }
  0xfd   :  { %3507 = vmatprep.mubr.f32.mxu0 %v4888_v27 }
 0x100   :  { %3508 = vmatmul.mubr.f32.gmra.mrb[10].mxu0 %v4924_v63  ;;  %v6029_v63 = vld [vmem:[#allocation17_spill] sm:$0xff] }
 0x101   :  { %3510 = vmatprep.mubr.f32.mxu0 %v4947_v19 }
 0x104   :  { %3511 = vmatmul.mubr.f32.gmra.mrb[12].mxu0 %v4990_v15 }
 0x105   :  { %3513 = vmatprep.mubr.f32.mxu0 %v4996_v0 }
 0x108   :  { %3514 = vmatmul.mubr.f32.gmra.mrb[14].mxu0 %v5026_v52 }
 0x1bf   :  { %v3494_v18 = vpop.f32.mrb[0].mxu0 }
 0x1c0   :  { %v5308_v38 = vsub.f32 %v6023_v25, %v3494_v18  ;;  %v1270_v39 = vpop.f32.mrb[1].mxu0 }
 0x1c1   :  { %v5311_v58 = vsub.f32 %v6025_v31, %v1270_v39  ;;  %v6035_v31 = vld [vmem:[#allocation30_spill] sm:$0xff] }
 0x1c2   :  { %6024 = vst [vmem:[#allocation16_spill] sm:$0xff] %v5308_v38  ;;  %v1381_v27 = vmul.f32 %v5308_v38, %v5308_v38 }
 0x1c3   :  { %6026 = vst [vmem:[#allocation11_spill] sm:$0xff] %v5311_v58  ;;  %v1380_v19 = vmul.f32 %v5311_v58, %v5311_v58  ;;  %v3497_v57 = vpop.f32.mrb[2].mxu0 }
 0x1c4   :  { %v5317_v61 = vand.u32 4294901760, %v1381_v27  ;;  %v5320_v5 = vsub.f32 %v6027_v62, %v3497_v57  ;;  %v1282_v15 = vpop.f32.mrb[3].mxu0 }
 0x1c5   :  { %v5322_v46 = vand.u32 4294901760, %v1380_v19  ;;  %v5325_v0 = vsub.f32 %v6029_v63, %v1282_v15  ;;  %v6037_v15 = vld [vmem:[#allocation27_spill] sm:$0xff] }
 0x1c6   :  { %6028 = vst [vmem:[#allocation20_spill] sm:$0xff] %v5320_v5  ;;  %v5328_v32 = vsub.f32 %v1381_v27, %v5317_v61  ;;  %v1383_v52 = vmul.f32 %v5320_v5, %v5320_v5  ;;  %v6047_v5 = vld [vmem:[#allocation38_spill] sm:$0xff] }
 0x1c7   :  { %6030 = vst [vmem:[#allocation24_spill] sm:$0xff] %v5325_v0  ;;  %v5333_v29 = vsub.f32 %v1380_v19, %v5322_v46  ;;  %v1382_v17 = vmul.f32 %v5325_v0, %v5325_v0  ;;  %v3500_v28 = vpop.f32.mrb[4].mxu0 }
 0x1c8   :  { %v5337_v59 = vand.u32 4294901760, %v1383_v52  ;;  %v5340_v3 = vsub.f32 %v6031_v23, %v3500_v28  ;;  %v1294_v44 = vpop.f32.mrb[5].mxu0  ;;  %v5863_v56 = vand.u32 4294901760, %v5328_v32 }
 0x1c9   :  { %v5343_v48 = vand.u32 4294901760, %v1382_v17  ;;  %v5346_v21 = vsub.f32 %v6033_v41, %v1294_v44  ;;  %v5865_v1 = vand.u32 4294901760, %v5333_v29 }
 0x1ca   :  { %6032 = vst [vmem:[#allocation12_spill] sm:$0xff] %v5340_v3  ;;  %v5350_v20 = vsub.f32 %v1383_v52, %v5337_v59  ;;  %v1385_v45 = vmul.f32 %v5340_v3, %v5340_v3  ;;  %v1490_v60 = vsub.f32 %v5328_v32, %v5863_v56 }
 0x1cb   :  { %6034 = vst [vmem:[#allocation25_spill] sm:$0xff] %v5346_v21  ;;  %v5358_v47 = vsub.f32 %v1382_v17, %v5343_v48  ;;  %v1384_v42 = vmul.f32 %v5346_v21, %v5346_v21  ;;  %v3503_v18 = vpop.f32.mrb[6].mxu0  ;;  %v1480_v25 = vsub.f32 %v5333_v29, %v5865_v1  ;;  %v6041_v1 = vld [vmem:[#allocation33_spill] sm:$0xff] }
 0x1cc   :  { %v5365_v39 = vand.u32 4294901760, %v1385_v45  ;;  %v5368_v27 = vsub.f32 %v6035_v31, %v3503_v18  ;;  %v1306_v19 = vpop.f32.mrb[7].mxu0  ;;  %v5864_v57 = vand.u32 4294901760, %v5350_v20  ;;  %v1491_v44 = vand.u32 4294901760, %v1490_v60 }
 0x1cd   :  { %v5371_v62 = vand.u32 4294901760, %v1384_v42  ;;  %v5374_v63 = vsub.f32 %v6037_v15, %v1306_v19  ;;  %v1481_v52 = vand.u32 4294901760, %v1480_v25  ;;  %v5869_v17 = vand.u32 4294901760, %v5358_v47  ;;  %v6039_v15 = vld [vmem:[#allocation34_spill] sm:$0xff] }
 0x1ce   :  { %6036 = vst [vmem:[#allocation28_spill] sm:$0xff] %v5368_v27  ;;  %v5378_v28 = vsub.f32 %v1385_v45, %v5365_v39  ;;  %v1387_v23 = vmul.f32 %v5368_v27, %v5368_v27  ;;  %v1510_v41 = vsub.f32 %v5350_v20, %v5864_v57 }
 0x1cf   :  { %6038 = vst [vmem:[#allocation15_spill] sm:$0xff] %v5374_v63  ;;  %v5386_v18 = vsub.f32 %v1384_v42, %v5371_v62  ;;  %v1386_v31 = vmul.f32 %v5374_v63, %v5374_v63  ;;  %v3506_v25 = vpop.f32.mrb[8].mxu0  ;;  %3548 = vmatprep.mubr.f32.mxu1 %v1481_v52  ;;  %v1500_v45 = vsub.f32 %v5358_v47, %v5869_v17  ;;  %v6043_v63 = vld [vmem:[#allocation36_spill] sm:$0xff] }
 0x1d0   :  { %v5393_v19 = vand.u32 4294901760, %v1387_v23  ;;  %v5396_v60 = vsub.f32 %v6039_v15, %v3506_v25  ;;  %v1318_v56 = vpop.f32.mrb[9].mxu0  ;;  %3549 = vmatmul.mubr.f32.vlgmr.msra.gmra.mrb[0].mxu1 %v1491_v44  ;;  %v5873_v57 = vand.u32 4294901760, %v5378_v28  ;;  %v1511_v15 = vand.u32 4294901760, %v1510_v41  ;;  %v6044_v44 = vld [vmem:[#allocation39_spill] sm:$0xff]  ;;  %v6045_v41 = vld [vmem:[#allocation42_spill] sm:$0xff] }
 0x1d1   :  { %v5399_v42 = vand.u32 4294901760, %v1386_v31  ;;  %v5402_v27 = vsub.f32 %v6041_v1, %v1318_v56  ;;  %4079 = vmatpush3.bf16.msra.mxu1 %v6043_v63  ;;  %v1501_v52 = vand.u32 4294901760, %v1500_v45  ;;  %v5877_v21 = vand.u32 4294901760, %v5386_v18 }
 0x1d2   :  { %6040 = vst [vmem:[#allocation29_spill] sm:$0xff] %v5396_v60  ;;  %v5407_v17 = vsub.f32 %v1387_v23, %v5393_v19  ;;  %v1389_v25 = vmul.f32 %v5396_v60, %v5396_v60  ;;  %4081 = vmatprep.subr.bf16.mxu1 %v6044_v44  ;;  %v1530_v3 = vsub.f32 %v5378_v28, %v5873_v57 }
 0x1d3   :  { %6042 = vst [vmem:[#allocation35_spill] sm:$0xff] %v5402_v27  ;;  %v5416_v56 = vsub.f32 %v1386_v31, %v5399_v42  ;;  %v1388_v1 = vmul.f32 %v5402_v27, %v5402_v27  ;;  %v3509_v63 = vpop.f32.mrb[10].mxu0  ;;  %3551 = vmatprep.mubr.f32.mxu1 %v1501_v52  ;;  %v1520_v23 = vsub.f32 %v5386_v18, %v5877_v21 }
 0x1d4   :  { %v5423_v45 = vand.u32 4294901760, %v1389_v25  ;;  %v5426_v60 = vsub.f32 %v6045_v41, %v3509_v63  ;;  %v1330_v0 = vpop.f32.mrb[11].mxu0  ;;  %3552 = vmatmul.mubr.f32.gmra.mrb[2].mxu1 %v1511_v15  ;;  %v5882_v57 = vand.u32 4294901760, %v5407_v17  ;;  %v1531_v41 = vand.u32 4294901760, %v1530_v3  ;;  %v6049_v15 = vld [vmem:[#allocation45_spill] sm:$0xff]  ;;  %v6050_v3 = vld [vmem:[#allocation46_spill] sm:$0xff] }
 0x1d5   :  { %v5429_v31 = vand.u32 4294901760, %v1388_v1  ;;  %v5432_v58 = vsub.f32 %v6047_v5, %v1330_v0  ;;  %4083 = vmatpush3.bf16.msra.mxu1 %v6044_v44  ;;  %v1521_v52 = vand.u32 4294901760, %v1520_v23  ;;  %v5888_v27 = vand.u32 4294901760, %v5416_v56 }
 0x1d6   :  { %6046 = vst [vmem:[#allocation19_spill] sm:$0xff] %v5426_v60  ;;  %v5437_v21 = vsub.f32 %v1389_v25, %v5423_v45  ;;  %v1391_v63 = vmul.f32 %v5426_v60, %v5426_v60  ;;  %4085 = vmatprep.subr.bf16.mxu1 %v6049_v15  ;;  %v1550_v38 = vsub.f32 %v5407_v17, %v5882_v57 }
 0x1d7   :  { %6048 = vst [vmem:[#allocation37_spill] sm:$0xff] %v5432_v58  ;;  %v5446_v5 = vsub.f32 %v1388_v1, %v5429_v31  ;;  %v1390_v0 = vmul.f32 %v5432_v58, %v5432_v58  ;;  %v3512_v44 = vpop.f32.mrb[12].mxu0  ;;  %3554 = vmatprep.mubr.f32.mxu1 %v1521_v52  ;;  %v1540_v25 = vsub.f32 %v5416_v56, %v5888_v27 }
 0x1d8   :  { %v5453_v23 = vand.u32 4294901760, %v1391_v63  ;;  %v5456_v60 = vsub.f32 %v6050_v3, %v3512_v44  ;;  %v1342_v24 = vpop.f32.mrb[13].mxu0  ;;  %3555 = vmatmul.mubr.f32.gmra.mrb[4].mxu1 %v1531_v41  ;;  %v5892_v57 = vand.u32 4294901760, %v5437_v21  ;;  %v1551_v3 = vand.u32 4294901760, %v1550_v38  ;;  %v6054_v38 = vld [vmem:[#allocation48_spill] sm:$0xff] }
 0x1d9   :  { %v5459_v1 = vand.u32 4294901760, %v1390_v0  ;;  %v5462_v22 = vsub.f32 %v6052_v30, %v1342_v24  ;;  %4087 = vmatpush3.bf16.msra.mxu1 %v6049_v15  ;;  %v1541_v52 = vand.u32 4294901760, %v1540_v25  ;;  %v5897_v58 = vand.u32 4294901760, %v5446_v5 }
 0x1da   :  { %6051 = vst [vmem:[#allocation40_spill] sm:$0xff] %v5456_v60  ;;  %v5467_v27 = vsub.f32 %v1391_v63, %v5453_v23  ;;  %v1393_v44 = vmul.f32 %v5456_v60, %v5456_v60  ;;  %4089 = vmatprep.subr.bf16.mxu1 %v5006_v12  ;;  %v1570_v41 = vsub.f32 %v5437_v21, %v5892_v57 }
 0x1db   :  { %6053 = vst [vmem:[#allocation21_spill] sm:$0xff] %v5462_v22  ;;  %v5476_v30 = vsub.f32 %v1390_v0, %v5459_v1  ;;  %v1392_v24 = vmul.f32 %v5462_v22, %v5462_v22  ;;  %v3515_v15 = vpop.f32.mrb[14].mxu0  ;;  %3557 = vmatprep.mubr.f32.mxu1 %v1541_v52  ;;  %v1560_v63 = vsub.f32 %v5446_v5, %v5897_v58 }
 0x1dc   :  { %v5483_v25 = vand.u32 4294901760, %v1393_v44  ;;  %v5486_v60 = vsub.f32 %v6054_v38, %v3515_v15  ;;  %v1354_v11 = vpop.f32.mrb[15].mxu0  ;;  %3558 = vmatmul.mubr.f32.gmra.mrb[6].mxu1 %v1551_v3  ;;  %v5898_v57 = vand.u32 4294901760, %v5467_v27  ;;  %v1571_v38 = vand.u32 4294901760, %v1570_v41 }
 0x1dd   :  { %v5489_v0 = vand.u32 4294901760, %v1392_v24  ;;  %v5492_v37 = vsub.f32 %v6056_v9, %v1354_v11  ;;  %4091 = vmatpush3.bf16.msra.mxu1 %v5006_v12  ;;  %v1561_v52 = vand.u32 4294901760, %v1560_v63  ;;  %v5900_v22 = vand.u32 4294901760, %v5476_v30 }
 0x1de   :  { %6055 = vst [vmem:[#allocation41_spill] sm:$0xff] %v5486_v60  ;;  %v5497_v58 = vsub.f32 %v1393_v44, %v5483_v25  ;;  %v1395_v15 = vmul.f32 %v5486_v60, %v5486_v60  ;;  %4093 = vmatprep.subr.bf16.mxu1 %v5015_v55  ;;  %v1590_v3 = vsub.f32 %v5467_v27, %v5898_v57 }
 0x1df   :  { %6057 = vst [vmem:[#allocation44_spill] sm:$0xff] %v5492_v37  ;;  %v5506_v9 = vsub.f32 %v1392_v24, %v5489_v0  ;;  %v1394_v12 = vmul.f32 %v5492_v37, %v5492_v37  ;;  %3560 = vmatprep.mubr.f32.mxu1 %v1561_v52  ;;  %v1580_v11 = vsub.f32 %v5476_v30, %v5900_v22 }
 0x1e0   :  { %v5513_v44 = vand.u32 4294901760, %v1395_v15  ;;  %3561 = vmatmul.mubr.f32.gmra.mrb[8].mxu1 %v1571_v38  ;;  %v1609_v41 = vand.u32 4294901760, %v5497_v58  ;;  %v1591_v52 = vand.u32 4294901760, %v1590_v3 }
 0x1e1   :  { %v5516_v63 = vand.u32 4294901760, %v1394_v12  ;;  %4095 = vmatpush3.bf16.msra.mxu1 %v5015_v55  ;;  %v1581_v57 = vand.u32 4294901760, %v1580_v11  ;;  %v1599_v24 = vand.u32 4294901760, %v5506_v9 }
 0x1e2   :  { %v5521_v60 = vsub.f32 %v1395_v15, %v5513_v44  ;;  %4097 = vmatprep.subr.bf16.mxu1 %v5085_v43  ;;  %v1610_v22 = vsub.f32 %v5497_v58, %v1609_v41 }
 0x1e3   :  { %v5528_v38 = vsub.f32 %v1394_v12, %v5516_v63  ;;  %3563 = vmatprep.mubr.f32.mxu1 %v1581_v57  ;;  %v1600_v55 = vsub.f32 %v5506_v9, %v1599_v24 }
 0x1e4   :  { %3564 = vmatmul.mubr.f32.gmra.mrb[10].mxu1 %v1591_v52  ;;  %v1629_v11 = vand.u32 4294901760, %v5521_v60  ;;  %v1611_v37 = vand.u32 4294901760, %v1610_v22  ;;  %v6058_v22 = vand.u32 4294901760, %v5333_v29 }
 0x1e5   :  { %4099 = vmatpush3.bf16.msra.mxu1 %v5085_v43  ;;  %v1601_v15 = vand.u32 4294901760, %v1600_v55  ;;  %v1619_v3 = vand.u32 4294901760, %v5528_v38 }
 0x1e6   :  { %4101 = vmatprep.subr.bf16.mxu1 %v5103_v14  ;;  %v1630_v12 = vsub.f32 %v5521_v60, %v1629_v11 }
 0x1e7   :  { %3566 = vmatprep.mubr.f32.mxu1 %v1601_v15  ;;  %v1620_v57 = vsub.f32 %v5528_v38, %v1619_v3  ;;  %v6079_v15 = vld [vmem:[#allocation24_spill] sm:$0xff] }
 0x1e8   :  { %3567 = vmatmul.mubr.f32.gmra.mrb[12].mxu1 %v1611_v37  ;;  %v1631_v43 = vand.u32 4294901760, %v1630_v12  ;;  %v6071_v37 = vand.u32 4294901760, %v5476_v30 }
 0x1e9   :  { %4103 = vmatpush3.bf16.msra.mxu1 %v5103_v14  ;;  %v1621_v52 = vand.u32 4294901760, %v1620_v57  ;;  %v6059_v14 = vand.u32 4294901760, %v5328_v32 }
 0x1ea   :  { %4105 = vmatprep.subr.bf16.mxu1 %v5110_v51 }
 0x1eb   :  { %3569 = vmatprep.mubr.f32.mxu1 %v1621_v52 }
 0x1ec   :  { %3570 = vmatmul.mubr.f32.gmra.mrb[14].mxu1 %v1631_v43 }
 0x1ed   :  { %4107 = vmatpush3.bf16.msra.mxu1 %v5110_v51  ;;  %3604 = vmatprep.mubr.f32.mxu1 %v5322_v46  ;;  %v6060_v51 = vand.u32 4294901760, %v5358_v47 }
 0x1ee   :  { %4109 = vmatprep.subr.bf16.mxu1 %v5116_v54 }
 0x1f0   :  { %3605 = vmatmul.mubr.f32.vlgmr.msra.gmra.mrb[0].mxu1 %v5317_v61 }
 0x1f1   :  { %3607 = vmatprep.mubr.f32.mxu1 %v5343_v48  ;;  %4111 = vmatpush3.bf16.msra.mxu1 %v5116_v54  ;;  %v6061_v54 = vand.u32 4294901760, %v5350_v20 }
 0x1f2   :  { %4113 = vmatprep.subr.bf16.mxu1 %v5123_v16 }
 0x1f4   :  { %3608 = vmatmul.mubr.f32.gmra.mrb[2].mxu1 %v5337_v59 }
 0x1f5   :  { %3610 = vmatprep.mubr.f32.mxu1 %v5371_v62  ;;  %4115 = vmatpush3.bf16.msra.mxu1 %v5123_v16  ;;  %v6062_v16 = vand.u32 4294901760, %v5386_v18 }
 0x1f6   :  { %4117 = vmatprep.subr.bf16.mxu1 %v5131_v33 }
 0x1f8   :  { %3611 = vmatmul.mubr.f32.gmra.mrb[4].mxu1 %v5365_v39 }
 0x1f9   :  { %3613 = vmatprep.mubr.f32.mxu1 %v5399_v42  ;;  %4119 = vmatpush3.bf16.msra.mxu1 %v5131_v33  ;;  %v6063_v33 = vld [vmem:[#allocation51_spill] sm:$0xff] }
 0x1fa   :  { %4121 = vmatprep.subr.bf16.mxu1 %v5139_v34 }
 0x1fc   :  { %3614 = vmatmul.mubr.f32.gmra.mrb[6].mxu1 %v5393_v19 }
 0x1fd   :  { %3616 = vmatprep.mubr.f32.mxu1 %v5429_v31  ;;  %4123 = vmatpush3.bf16.msra.mxu1 %v5139_v34  ;;  %v6064_v34 = vand.u32 4294901760, %v5378_v28 }
 0x1fe   :  { %4125 = vmatprep.subr.bf16.mxu1 %v5147_v40 }
 0x200   :  { %3617 = vmatmul.mubr.f32.gmra.mrb[8].mxu1 %v5423_v45 }
 0x201   :  { %3619 = vmatprep.mubr.f32.mxu1 %v5459_v1  ;;  %4127 = vmatpush3.bf16.msra.mxu1 %v5147_v40  ;;  %v6065_v40 = vand.u32 4294901760, %v5416_v56 }
 0x202   :  { %4129 = vmatprep.subr.bf16.mxu1 %v5155_v49 }
 0x204   :  { %3620 = vmatmul.mubr.f32.gmra.mrb[10].mxu1 %v5453_v23 }
 0x205   :  { %3622 = vmatprep.mubr.f32.mxu1 %v5489_v0  ;;  %4131 = vmatpush3.bf16.msra.mxu1 %v5155_v49  ;;  %v6066_v49 = vld [vmem:[#allocation52_spill] sm:$0xff] }
 0x206   :  { %4133 = vmatprep.subr.bf16.mxu1 %v5163_v53 }
 0x208   :  { %3623 = vmatmul.mubr.f32.gmra.mrb[12].mxu1 %v5483_v25 }
 0x209   :  { %3625 = vmatprep.mubr.f32.mxu1 %v5516_v63  ;;  %4135 = vmatpush3.bf16.msra.mxu1 %v5163_v53  ;;  %v6067_v53 = vand.u32 4294901760, %v5407_v17 }
 0x20a   :  { %4137 = vmatprep.subr.bf16.mxu1 %v5171_v26 }
 0x20c   :  { %3626 = vmatmul.mubr.f32.gmra.mrb[14].mxu1 %v5513_v44 }
 0x20d   :  { %4139 = vmatpush3.bf16.msra.mxu1 %v5171_v26  ;;  %3660 = vmatprep.mubr.f32.mxu1 %v5333_v29  ;;  %v6068_v26 = vand.u32 4294901760, %v5446_v5  ;;  %v6073_v29 = vand.u32 4294901760, %v5467_v27 }
 0x20e   :  { %4141 = vmatprep.subr.bf16.mxu1 %v5986_v6 }
 0x210   :  { %3661 = vmatmul.mubr.f32.vlgmr.msra.gmra.mrb[0].mxu1 %v5328_v32  ;;  %v6072_v32 = vld [vmem:[#allocation54_spill] sm:$0xff] }
 0x211   :  { %3663 = vmatprep.mubr.f32.mxu1 %v5358_v47  ;;  %4143 = vmatpush3.bf16.msra.mxu1 %v5986_v6 }
 0x212   :  { %4145 = vmatprep.subr.bf16.mxu1 %v5989_v36 }
 0x214   :  { %3664 = vmatmul.mubr.f32.gmra.mrb[2].mxu1 %v5350_v20  ;;  %v6074_v20 = vld [vmem:[#allocation55_spill] sm:$0xff] }
 0x215   :  { %3666 = vmatprep.mubr.f32.mxu1 %v5386_v18  ;;  %4147 = vmatpush3.bf16.msra.mxu1 %v5989_v36 }
 0x216   :  { %4149 = vmatprep.subr.bf16.mxu1 %v5992_v4 }
 0x218   :  { %3667 = vmatmul.mubr.f32.gmra.mrb[4].mxu1 %v5378_v28 }
 0x219   :  { %3669 = vmatprep.mubr.f32.mxu1 %v5416_v56  ;;  %4151 = vmatpush3.bf16.msra.mxu1 %v5992_v4 }
 0x21a   :  { %4153 = vmatprep.subr.bf16.mxu1 %v5995_v50 }
 0x21c   :  { %3670 = vmatmul.mubr.f32.gmra.mrb[6].mxu1 %v5407_v17 }
 0x21d   :  { %3672 = vmatprep.mubr.f32.mxu1 %v5446_v5  ;;  %4155 = vmatpush3.bf16.msra.mxu1 %v5995_v50  ;;  %v6077_v5 = vld [vmem:[#allocation11_spill] sm:$0xff] }
 0x21e   :  { %4157 = vmatprep.subr.bf16.mxu1 %v5998_v2 }
 0x220   :  { %3673 = vmatmul.mubr.f32.gmra.mrb[8].mxu1 %v5437_v21 }
 0x221   :  { %3675 = vmatprep.mubr.f32.mxu1 %v5476_v30  ;;  %4159 = vmatpush3.bf16.msra.mxu1 %v5998_v2 }
 0x222   :  { %4161 = vmatprep.subr.bf16.mxu1 %v6001_v7 }
 0x224   :  { %3676 = vmatmul.mubr.f32.gmra.mrb[10].mxu1 %v5467_v27 }
 0x225   :  { %3678 = vmatprep.mubr.f32.mxu1 %v5506_v9  ;;  %4163 = vmatpush3.bf16.msra.mxu1 %v6001_v7 }
 0x226   :  { %4165 = vmatprep.subr.bf16.mxu1 %v6002_v13 }
 0x228   :  { %3679 = vmatmul.mubr.f32.gmra.mrb[12].mxu1 %v5497_v58 }
 0x229   :  { %3681 = vmatprep.mubr.f32.mxu1 %v5528_v38  ;;  %4167 = vmatpush3.bf16.msra.mxu1 %v6002_v13 }
 0x22a   :  { %4169 = vmatprep.subr.bf16.mxu1 %v6003_v10 }
 0x22c   :  { %3682 = vmatmul.mubr.f32.gmra.mrb[14].mxu1 %v5521_v60 }
 0x22d   :  { %4171 = vmatpush3.bf16.msra.mxu1 %v6003_v10  ;;  %3716 = vmatprep.mubr.f32.mxu1 %v6058_v22 }
 0x22e   :  { %4173 = vmatprep.subr.bf16.mxu1 %v6005_v8 }
 0x230   :  { %3717 = vmatmul.mubr.f32.vlgmr.msra.gmra.mrb[0].mxu1 %v6059_v14 }
 0x231   :  { %3719 = vmatprep.mubr.f32.mxu1 %v6060_v51  ;;  %4175 = vmatpush3.bf16.msra.mxu1 %v6005_v8  ;;  %v6070_v8 = vand.u32 4294901760, %v5437_v21  ;;  %v6075_v21 = vld [vmem:[#allocation56_spill] sm:$0xff] }
 0x232   :  { %4177 = vmatprep.subr.bf16.mxu1 %v6008_v35 }
 0x234   :  { %3720 = vmatmul.mubr.f32.gmra.mrb[2].mxu1 %v6061_v54 }
 0x235   :  { %3722 = vmatprep.mubr.f32.mxu1 %v6062_v16  ;;  %4179 = vmatpush3.bf16.msra.mxu1 %v6008_v35  ;;  %v6069_v35 = vld [vmem:[#allocation53_spill] sm:$0xff]  ;;  %v6080_v16 = vld [vmem:[#allocation12_spill] sm:$0xff] }
 0x236   :  { %4181 = vmatprep.subr.bf16.mxu1 %v6063_v33 }
 0x238   :  { %3723 = vmatmul.mubr.f32.gmra.mrb[4].mxu1 %v6064_v34 }
 0x239   :  { %3725 = vmatprep.mubr.f32.mxu1 %v6065_v40  ;;  %4183 = vmatpush3.bf16.msra.mxu1 %v6063_v33 }
 0x23a   :  { %4185 = vmatprep.subr.bf16.mxu1 %v6066_v49 }
 0x23c   :  { %3726 = vmatmul.mubr.f32.gmra.mrb[6].mxu1 %v6067_v53 }
 0x23d   :  { %3728 = vmatprep.mubr.f32.mxu1 %v6068_v26  ;;  %4187 = vmatpush3.bf16.msra.mxu1 %v6066_v49  ;;  %v6081_v49 = vld [vmem:[#allocation25_spill] sm:$0xff] }
 0x23e   :  { %4189 = vmatprep.subr.bf16.mxu1 %v6069_v35 }
 0x240   :  { %3729 = vmatmul.mubr.f32.gmra.mrb[8].mxu1 %v6070_v8 }
 0x241   :  { %3731 = vmatprep.mubr.f32.mxu1 %v6071_v37  ;;  %4191 = vmatpush3.bf16.msra.mxu1 %v6069_v35 }
 0x242   :  { %4193 = vmatprep.subr.bf16.mxu1 %v6072_v32 }
 0x244   :  { %3732 = vmatmul.mubr.f32.gmra.mrb[10].mxu1 %v6073_v29 }
 0x245   :  { %3734 = vmatprep.mubr.f32.mxu1 %v1599_v24  ;;  %4195 = vmatpush3.bf16.msra.mxu1 %v6072_v32  ;;  %v6078_v24 = vld [vmem:[#allocation20_spill] sm:$0xff] }
 0x246   :  { %4197 = vmatprep.subr.bf16.mxu1 %v6074_v20 }
 0x248   :  { %3735 = vmatmul.mubr.f32.gmra.mrb[12].mxu1 %v1609_v41 }
 0x249   :  { %3737 = vmatprep.mubr.f32.mxu1 %v1619_v3  ;;  %4199 = vmatpush3.bf16.msra.mxu1 %v6074_v20 }
 0x24a   :  { %4201 = vmatprep.subr.bf16.mxu1 %v6075_v21 }
 0x24c   :  { %3738 = vmatmul.mubr.f32.gmra.mrb[14].mxu1 %v1629_v11 }
 0x24d   :  { %4203 = vmatpush3.bf16.msra.mxu1 %v6075_v21  ;;  %3772 = vmatprep.mubr.f32.mxu1 %v5322_v46 }
 0x24e   :  { %4205 = vmatprep.subr.bf16.mxu1 %v5986_v6 }
 0x250   :  { %3773 = vmatmul.mubr.f32.vlgmr.msra.gmra.mrb[0].mxu1 %v5317_v61 }
 0x251   :  { %3775 = vmatprep.mubr.f32.mxu1 %v5343_v48  ;;  %4207 = vmatpush3.bf16.msra.mxu1 %v5986_v6 }
 0x252   :  { %4209 = vmatprep.subr.bf16.mxu1 %v5989_v36 }
 0x254   :  { %3776 = vmatmul.mubr.f32.gmra.mrb[2].mxu1 %v5337_v59 }
 0x255   :  { %3778 = vmatprep.mubr.f32.mxu1 %v5371_v62  ;;  %4211 = vmatpush3.bf16.msra.mxu1 %v5989_v36 }
 0x256   :  { %4213 = vmatprep.subr.bf16.mxu1 %v5992_v4 }
 0x258   :  { %3779 = vmatmul.mubr.f32.gmra.mrb[4].mxu1 %v5365_v39 }
 0x259   :  { %3781 = vmatprep.mubr.f32.mxu1 %v5399_v42  ;;  %4215 = vmatpush3.bf16.msra.mxu1 %v5992_v4 }
 0x25a   :  { %4217 = vmatprep.subr.bf16.mxu1 %v5995_v50 }
 0x25c   :  { %3782 = vmatmul.mubr.f32.gmra.mrb[6].mxu1 %v5393_v19 }
 0x25d   :  { %3784 = vmatprep.mubr.f32.mxu1 %v5429_v31  ;;  %4219 = vmatpush3.bf16.msra.mxu1 %v5995_v50 }
 0x25e   :  { %4221 = vmatprep.subr.bf16.mxu1 %v5998_v2 }
 0x260   :  { %3785 = vmatmul.mubr.f32.gmra.mrb[8].mxu1 %v5423_v45 }
 0x261   :  { %3787 = vmatprep.mubr.f32.mxu1 %v5459_v1  ;;  %4223 = vmatpush3.bf16.msra.mxu1 %v5998_v2 }
 0x262   :  { %4225 = vmatprep.subr.bf16.mxu1 %v6001_v7 }
 0x264   :  { %3788 = vmatmul.mubr.f32.gmra.mrb[10].mxu1 %v5453_v23 }
 0x265   :  { %3790 = vmatprep.mubr.f32.mxu1 %v5489_v0  ;;  %4227 = vmatpush3.bf16.msra.mxu1 %v6001_v7 }
 0x266   :  { %4229 = vmatprep.subr.bf16.mxu1 %v6002_v13 }
 0x268   :  { %3791 = vmatmul.mubr.f32.gmra.mrb[12].mxu1 %v5483_v25 }
 0x269   :  { %3793 = vmatprep.mubr.f32.mxu1 %v5516_v63  ;;  %4231 = vmatpush3.bf16.msra.mxu1 %v6002_v13 }
 0x26a   :  { %4233 = vmatprep.subr.bf16.mxu1 %v6003_v10 }
 0x26c   :  { %3794 = vmatmul.mubr.f32.gmra.mrb[14].mxu1 %v5513_v44 }
 0x26d   :  { %4235 = vmatpush3.bf16.msra.mxu1 %v6003_v10  ;;  %3828 = vmatprep.mubr.f32.mxu1 %v5322_v46 }
 0x270   :  { %3829 = vmatmul.mubr.f32.vlgmr.msra.gmra.mrb[0].mxu1 %v5317_v61 }
 0x271   :  { %3831 = vmatprep.mubr.f32.mxu1 %v5343_v48  ;;  %v5709_v48 = vld [vmem:[%s5781_s2] ss:$0 sm:$0xff]  ;;  %s4525_s2 = smov [#allocation7]  }
 0x274   :  { %3832 = vmatmul.mubr.f32.gmra.mrb[2].mxu1 %v5337_v59 }
 0x275   :  { %3834 = vmatprep.mubr.f32.mxu1 %v5371_v62 }
 0x278   :  { %3835 = vmatmul.mubr.f32.gmra.mrb[4].mxu1 %v5365_v39 }
 0x279   :  { %3837 = vmatprep.mubr.f32.mxu1 %v5399_v42  ;;  %v6076_v42 = vld [vmem:[#allocation16_spill] sm:$0xff] }
 0x27c   :  { %3838 = vmatmul.mubr.f32.gmra.mrb[6].mxu1 %v5393_v19  ;;  %v5715_v19 = vld [vmem:[%s5782_s3] ss:$0 sm:$0xff]  ;;  %s2781_s3 = sshll.u32 %s4525_s2, 4  ;;  %s2782_s3 = int_to_ptr.vmem [resolvable:$true] %s2781_s3 }
 0x27d   :  { %3840 = vmatprep.mubr.f32.mxu1 %v5429_v31  ;;  %s4493_s17 = scalar_lea.vmem %s2782_s3, 2048  ;;  %p4498_p3 = scmp.lt.s32.totalorder %s2782_s3, %s2782_s3 }
 0x27e   :  { %p4494_p2 = scmp.ne.s32.totalorder %s2782_s3, %s4493_s17  ;;  %p4499_p4 = scmp.lt.s32.totalorder %s4493_s17, %s4493_s17 }
 0x280   :  { %3841 = vmatmul.mubr.f32.gmra.mrb[8].mxu1 %v5423_v45  ;;  %p4500_p5 = por %p4499_p4, %p4498_p3 }
 0x281   :  { %3843 = vmatprep.mubr.f32.mxu1 %v5459_v1 }
 0x282   :  { %p4501_p6 = pnand %p4500_p5, %p4494_p2 }
 0x284   :  { %3844 = vmatmul.mubr.f32.gmra.mrb[10].mxu1 %v5453_v23 }
 0x285   :  { %3846 = vmatprep.mubr.f32.mxu1 %v5489_v0 }
 0x288   :  { %3847 = vmatmul.mubr.f32.gmra.mrb[12].mxu1 %v5483_v25 }
 0x289   :  { %3849 = vmatprep.mubr.f32.mxu1 %v5516_v63 }
 0x28c   :  { %3850 = vmatmul.mubr.f32.gmra.mrb[14].mxu1 %v5513_v44 }
 0x343   :  { %v3830_v6 = vpop.f32.mrb[0].mxu1 }
 0x344   :  { %v4236_v36 = vadd.f32 1e-05, %v3830_v6  ;;  %v2588_v4 = vpop.f32.mrb[1].mxu1  ;;  %v6082_v6 = vld [vmem:[#allocation28_spill] sm:$0xff] }
 0x345   :  { %v4237_v50 = vadd.f32 1e-05, %v2588_v4 }
 0x346   :  { %4417 = vrsqrt.f32 %v4236_v36 }
 0x347   :  { %4419 = vrsqrt.f32 %v4237_v50  ;;  %v3833_v2 = vpop.f32.mrb[2].mxu1 }
 0x348   :  { %v4238_v7 = vadd.f32 1e-05, %v3833_v2  ;;  %v2600_v13 = vpop.f32.mrb[3].mxu1  ;;  %v6083_v2 = vld [vmem:[#allocation15_spill] sm:$0xff] }
 0x349   :  { %v4239_v10 = vadd.f32 1e-05, %v2600_v13 }
 0x34a   :  { %4421 = vrsqrt.f32 %v4238_v7 }
 0x34b   :  { %4423 = vrsqrt.f32 %v4239_v10  ;;  %v3836_v58 = vpop.f32.mrb[4].mxu1 }
 0x34c   :  { %v4240_v61 = vadd.f32 1e-05, %v3836_v58  ;;  %v2612_v46 = vpop.f32.mrb[5].mxu1 }
 0x34d   :  { %v4241_v59 = vadd.f32 1e-05, %v2612_v46 }
 0x34e   :  { %4425 = vrsqrt.f32 %v4240_v61 }
 0x34f   :  { %4427 = vrsqrt.f32 %v4241_v59  ;;  %v3839_v47 = vpop.f32.mrb[6].mxu1 }
 0x350   :  { %v4418_v39 = vpop.eup %4417  ;;  %v4242_v27 = vadd.f32 1e-05, %v3839_v47  ;;  %v2624_v62 = vpop.f32.mrb[7].mxu1 }
 0x351   :  { %v4420_v17 = vpop.eup %4419  ;;  %v2706_v28 = vmul.f32 %v4418_v39, %v5709_v48  ;;  %v4243_v18 = vadd.f32 1e-05, %v2624_v62 }
 0x352   :  { %v2705_v60 = vmul.f32 %v4420_v17, %v5709_v48  ;;  %4429 = vrsqrt.f32 %v4242_v27  ;;  %v6084_v27 = vld [vmem:[#allocation29_spill] sm:$0xff] }
 0x353   :  { %v2722_v56 = vmul.f32 %v2706_v28, %v6076_v42  ;;  %4431 = vrsqrt.f32 %v4243_v18  ;;  %v3842_v45 = vpop.f32.mrb[8].mxu1  ;;  %v6085_v28 = vld [vmem:[#allocation35_spill] sm:$0xff] }
 0x354   :  { %v4422_v31 = vpop.eup %4421  ;;  %v2721_v23 = vmul.f32 %v2705_v60, %v6077_v5  ;;  %v4244_v1 = vadd.f32 1e-05, %v3842_v45  ;;  %v2636_v30 = vpop.f32.mrb[9].mxu1  ;;  %v6086_v5 = vld [vmem:[#allocation19_spill] sm:$0xff] }
 0x355   :  { %v4424_v25 = vpop.eup %4423  ;;  %v2745_v0 = vadd.f32 %v5715_v19, %v2722_v56  ;;  %v2708_v9 = vmul.f32 %v4422_v31, %v5709_v48  ;;  %v4245_v44 = vadd.f32 1e-05, %v2636_v30  ;;  %v6087_v30 = vld [vmem:[#allocation37_spill] sm:$0xff] }
 0x356   :  { %v2744_v41 = vadd.f32 %v5715_v19, %v2721_v23  ;;  %v2707_v63 = vmul.f32 %v4424_v25, %v5709_v48  ;;  %4433 = vrsqrt.f32 %v4244_v1 }
 0x357   :  { %2761 = vst [vmem:[#allocation7 + $0x8] sm:$0xff] %v2745_v0  ;;  %v2724_v38 = vmul.f32 %v2708_v9, %v6078_v24  ;;  %4435 = vrsqrt.f32 %v4245_v44  ;;  %v3845_v55 = vpop.f32.mrb[10].mxu1  ;;  %v6088_v24 = vld [vmem:[#allocation40_spill] sm:$0xff] }
 0x358   :  { %v4426_v11 = vpop.eup %4425  ;;  %2760 = vst [vmem:[#allocation7] sm:$0xff] %v2744_v41  ;;  %v2723_v3 = vmul.f32 %v2707_v63, %v6079_v15  ;;  %v4246_v12 = vadd.f32 1e-05, %v3845_v55  ;;  %v2648_v57 = vpop.f32.mrb[11].mxu1 }
 0x359   :  { %v4428_v52 = vpop.eup %4427  ;;  %v2747_v43 = vadd.f32 %v5715_v19, %v2724_v38  ;;  %v2710_v22 = vmul.f32 %v4426_v11, %v5709_v48  ;;  %v4247_v14 = vadd.f32 1e-05, %v2648_v57  ;;  %v6089_v11 = vld [vmem:[#allocation21_spill] sm:$0xff] }
 0x35a   :  { %v2746_v51 = vadd.f32 %v5715_v19, %v2723_v3  ;;  %v2709_v54 = vmul.f32 %v4428_v52, %v5709_v48  ;;  %4437 = vrsqrt.f32 %v4246_v12 }
 0x35b   :  { %2763 = vst [vmem:[#allocation7 + $0x18] sm:$0xff] %v2747_v43  ;;  %v2726_v33 = vmul.f32 %v2710_v22, %v6080_v16  ;;  %4439 = vrsqrt.f32 %v4247_v14  ;;  %v3848_v34 = vpop.f32.mrb[12].mxu1  ;;  %v6090_v22 = vld [vmem:[#allocation41_spill] sm:$0xff] }
 0x35c   :  { %v4430_v40 = vpop.eup %4429  ;;  %2762 = vst [vmem:[#allocation7 + $0x10] sm:$0xff] %v2746_v51  ;;  %v2725_v53 = vmul.f32 %v2709_v54, %v6081_v49  ;;  %v4248_v26 = vadd.f32 1e-05, %v3848_v34  ;;  %v2660_v35 = vpop.f32.mrb[13].mxu1  ;;  %v6091_v51 = vld [vmem:[#allocation44_spill] sm:$0xff] }
 0x35d   :  { %v4432_v8 = vpop.eup %4431  ;;  %v2749_v37 = vadd.f32 %v5715_v19, %v2726_v33  ;;  %v2712_v32 = vmul.f32 %v4430_v40, %v5709_v48  ;;  %v4249_v29 = vadd.f32 1e-05, %v2660_v35 }
 0x35e   :  { %v2748_v20 = vadd.f32 %v5715_v19, %v2725_v53  ;;  %v2711_v21 = vmul.f32 %v4432_v8, %v5709_v48  ;;  %4441 = vrsqrt.f32 %v4248_v26 }
 0x35f   :  { %2765 = vst [vmem:[#allocation7 + $0x28] sm:$0xff] %v2749_v37  ;;  %v2728_v36 = vmul.f32 %v2712_v32, %v6082_v6  ;;  %4443 = vrsqrt.f32 %v4249_v29  ;;  %v3851_v4 = vpop.f32.mrb[14].mxu1 }
 0x360   :  { %v4434_v50 = vpop.eup %4433  ;;  %2764 = vst [vmem:[#allocation7 + $0x20] sm:$0xff] %v2748_v20  ;;  %v2727_v7 = vmul.f32 %v2711_v21, %v6083_v2  ;;  %v4250_v13 = vadd.f32 1e-05, %v3851_v4  ;;  %v2672_v10 = vpop.f32.mrb[15].mxu1 }
 0x361   :  { %v4436_v58 = vpop.eup %4435  ;;  %v2751_v61 = vadd.f32 %v5715_v19, %v2728_v36  ;;  %v2714_v46 = vmul.f32 %v4434_v50, %v5709_v48  ;;  %v4251_v59 = vadd.f32 1e-05, %v2672_v10 }
 0x362   :  { %v2750_v47 = vadd.f32 %v5715_v19, %v2727_v7  ;;  %v2713_v39 = vmul.f32 %v4436_v58, %v5709_v48  ;;  %4445 = vrsqrt.f32 %v4250_v13 }
 0x363   :  { %2767 = vst [vmem:[#allocation7 + $0x38] sm:$0xff] %v2751_v61  ;;  %v2730_v62 = vmul.f32 %v2714_v46, %v6084_v27  ;;  %4447 = vrsqrt.f32 %v4251_v59 }
 0x364   :  { %v4438_v17 = vpop.eup %4437  ;;  %2766 = vst [vmem:[#allocation7 + $0x30] sm:$0xff] %v2750_v47  ;;  %v2729_v18 = vmul.f32 %v2713_v39, %v6085_v28 }
 0x365   :  { %v4440_v60 = vpop.eup %4439  ;;  %v2753_v42 = vadd.f32 %v5715_v19, %v2730_v62  ;;  %v2716_v56 = vmul.f32 %v4438_v17, %v5709_v48 }
 0x366   :  { %v2752_v45 = vadd.f32 %v5715_v19, %v2729_v18  ;;  %v2715_v31 = vmul.f32 %v4440_v60, %v5709_v48 }
 0x367   :  { %2769 = vst [vmem:[#allocation7 + $0x48] sm:$0xff] %v2753_v42  ;;  %v2732_v23 = vmul.f32 %v2716_v56, %v6086_v5 }
 0x368   :  { %v4442_v1 = vpop.eup %4441  ;;  %2768 = vst [vmem:[#allocation7 + $0x40] sm:$0xff] %v2752_v45  ;;  %v2731_v25 = vmul.f32 %v2715_v31, %v6087_v30 }
 0x369   :  { %v4444_v0 = vpop.eup %4443  ;;  %v2755_v9 = vadd.f32 %v5715_v19, %v2732_v23  ;;  %v2718_v44 = vmul.f32 %v4442_v1, %v5709_v48 }
 0x36a   :  { %v2754_v41 = vadd.f32 %v5715_v19, %v2731_v25  ;;  %v2717_v63 = vmul.f32 %v4444_v0, %v5709_v48 }
 0x36b   :  { %2771 = vst [vmem:[#allocation7 + $0x58] sm:$0xff] %v2755_v9  ;;  %v2734_v38 = vmul.f32 %v2718_v44, %v6088_v24 }
 0x36c   :  { %v4446_v55 = vpop.eup %4445  ;;  %2770 = vst [vmem:[#allocation7 + $0x50] sm:$0xff] %v2754_v41  ;;  %v2733_v15 = vmul.f32 %v2717_v63, %v6089_v11 }
 0x36d   :  { %v4448_v3 = vpop.eup %4447  ;;  %v2757_v12 = vadd.f32 %v5715_v19, %v2734_v38  ;;  %v2720_v57 = vmul.f32 %v4446_v55, %v5709_v48 }
 0x36e   :  { %v2756_v52 = vadd.f32 %v5715_v19, %v2733_v15  ;;  %v2719_v43 = vmul.f32 %v4448_v3, %v5709_v48 }
 0x36f   :  { %2773 = vst [vmem:[#allocation7 + $0x68] sm:$0xff] %v2757_v12  ;;  %v2736_v14 = vmul.f32 %v2720_v57, %v6090_v22 }
 0x370   :  { %2772 = vst [vmem:[#allocation7 + $0x60] sm:$0xff] %v2756_v52  ;;  %v2735_v54 = vmul.f32 %v2719_v43, %v6091_v51 }
 0x371   :  { %v2759_v16 = vadd.f32 %v5715_v19, %v2736_v14 }
 0x372   :  { %v2758_v33 = vadd.f32 %v5715_v19, %v2735_v54 }
 0x373   :  { %2775 = vst [vmem:[#allocation7 + $0x78] sm:$0xff] %v2759_v16 }
 0x374   :  { %2774 = vst [vmem:[#allocation7 + $0x70] sm:$0xff] %v2758_v33 }
 0x375   :  { %4504 = shalt.err (!%p4501_p6)
}
 0x376   :  { %s4505_s20 = scalar_lea.hbm %s5783_s4, 2048 }
 0x377   :  { %p4506_p7 = scmp.ne.s32.totalorder %s5783_s4, %s4505_s20  ;;  %p4509_p8 = scmp.lt.u32.totalorder %s4505_s20, %s5783_s4 }
 0x379   :  { %p4511_p9 = pnand %p4509_p8, %p4506_p7 }
 0x37b   :  { %4514 = shalt.err (!%p4511_p9)
}
 0x37c   :  { %2787 = dma.vmem_to_hbm [thread:$0]  %s2782_s3, 2048, %s5783_s4, [#allocation4], %s4522_s25, %s4522_s25, %s4523_s26  }
 0x37d   :  { %4519 = dma.done.wait [#allocation4], 2048  }
 0x37e   :  { %4520 = vsyncadd [#allocation4], 4294965248 }
 0x37f   :  { %2791 = vsyncpa [#allocation3], 1 }
 0x380   :  { %2792 = vsyncpa [#allocation6], 1 }
 0x381   :  { %2793 = vsyncpa [#allocation4], 1 }

</bundles_post_ra>
